<compile_context>
chip_gen: v5e
topology: v5e:2x2
jax: 0.10.0
libtpu: 0.0.40
codegen_flags: <defaults>
</compile_context>

<pallas_src>
import math

import jax
import jax.numpy as jnp
from jax import lax
from jax.experimental import pallas as pl
from jax.experimental.pallas import tpu as pltpu


def _round_up(n, m):
    return ((n + m - 1) // m) * m


def lstm_kernel(x_ref, wih_ref, whh_ref, b_ref, wlin_ref, blin_ref, out_ref, gx_ref):
    """Single-invocation LSTM recurrence + final Linear.

    Shapes (all zero-padded, f32):
      x_ref:    (seq_len, IN_PAD)
      wih_ref:  (IN_PAD, 4*HP)   fused input->gate weights, gate order (i, f, g, o)
      whh_ref:  (HP, 4*HP)       fused hidden->gate weights
      b_ref:    (1, 4*HP)        combined b_ih + b_hh
      wlin_ref: (OUT, HP)        final Linear weight rows
      blin_ref: (OUT, 1)
      out_ref:  (OUT, 1)
      gx_ref:   (seq_len, 4*HP)  scratch: hoisted input projection + bias
    """
    seq_len = x_ref.shape[0]
    hp = whh_ref.shape[0]

    # Hoisted + fused input projection and bias for ALL timesteps at once:
    # one (seq_len, IN_PAD) @ (IN_PAD, 4*HP) matmul instead of 4*seq_len K=1 dots
    # inside the serial recurrence.
    gx_ref[...] = (
        jnp.dot(x_ref[...], wih_ref[...], preferred_element_type=jnp.float32)
        + b_ref[...]
    )

    whh = whh_ref[...]  # (HP, 4*HP) fused recurrent weights

    def step(t, carry):
        h, c = carry
        # Single fused recurrent matmul per step: (1, HP) @ (HP, 4*HP).
        g = gx_ref[pl.ds(t, 1), :] + jnp.dot(
            h, whh, preferred_element_type=jnp.float32
        )
        # Static 128-lane gate slices (HP is a multiple of 128) -> no layout fixups.
        i_g = jax.nn.sigmoid(g[:, 0 * hp:1 * hp])
        f_g = jax.nn.sigmoid(g[:, 1 * hp:2 * hp])
        g_g = jnp.tanh(g[:, 2 * hp:3 * hp])
        o_g = jax.nn.sigmoid(g[:, 3 * hp:4 * hp])
        c_new = f_g * c + i_g * g_g
        h_new = o_g * jnp.tanh(c_new)
        return h_new, c_new

    h0 = jnp.zeros((1, hp), jnp.float32)
    c0 = jnp.zeros((1, hp), jnp.float32)
    # Fully unrolled recurrence: seq_len is small and static; gives the scheduler
    # cross-iteration visibility (EUP/VPU epilogue of step t overlaps step t+1).
    h_final, _ = lax.fori_loop(0, seq_len, step, (h0, c0), unroll=True)

    # Final Linear (HP -> OUT) as VPU multiply + cross-lane reduce instead of a
    # full MXU push for a single output column. Padded lanes of h are exactly 0.
    out_ref[...] = (
        jnp.sum(h_final * wlin_ref[...], axis=-1, keepdims=True) + blin_ref[...]
    )


def lstm_forward(x, w_ih, w_hh, b_ih, b_hh, w_lin, b_lin):
    """x: (seq_len, input_size). Returns predictions[-1], shape (output_size,)."""
    seq_len, input_size = x.shape
    hidden = w_hh.shape[1]
    output_size = w_lin.shape[0]

    HP = _round_up(hidden, 128)      # hidden padded to one full 128-lane vreg row
    INP = _round_up(input_size, 8)   # contraction dim padded to a sublane multiple
    G = 4 * HP
    f32 = jnp.float32

    # Repack to fused, pre-transposed, zero-padded 2-D slabs.
    # PyTorch gate order is (i, f, g, o); each gate occupies a 128-lane-aligned
    # slice of the fused 4*HP axis.
    wih4 = w_ih.reshape(4, hidden, input_size).astype(f32)
    whh4 = w_hh.reshape(4, hidden, hidden).astype(f32)
    b4 = (b_ih + b_hh).reshape(4, hidden).astype(f32)

    wih_k = jnp.zeros((INP, G), f32)
    whh_k = jnp.zeros((HP, G), f32)
    b_k = jnp.zeros((1, G), f32)
    for g in range(4):
        wih_k = wih_k.at[:input_size, g * HP:g * HP + hidden].set(wih4[g].T)
        whh_k = whh_k.at[:hidden, g * HP:g * HP + hidden].set(whh4[g].T)
        b_k = b_k.at[0, g * HP:g * HP + hidden].set(b4[g])

    wlin_k = jnp.zeros((output_size, HP), f32).at[:, :hidden].set(w_lin.astype(f32))
    blin_k = b_lin.reshape(output_size, 1).astype(f32)
    x_k = jnp.zeros((seq_len, INP), f32).at[:, :input_size].set(x.astype(f32))

    vmem = pl.BlockSpec(memory_space=pltpu.MemorySpace.VMEM)
    out = pl.pallas_call(
        lstm_kernel,
        out_shape=jax.ShapeDtypeStruct((output_size, 1), f32),
        in_specs=[vmem] * 6,
        out_specs=vmem,
        scratch_shapes=[pltpu.VMEM((seq_len, G), f32)],
    )(x_k, wih_k, whh_k, b_k, wlin_k, blin_k)
    return out[:, 0]  # (output_size,)


def lstm_reference(x, w_ih, w_hh, b_ih, b_hh, w_lin, b_lin):
    """Pure-JAX reference matching torch.nn.LSTM + Linear semantics."""
    hidden = w_hh.shape[1]

    def step(carry, x_t):
        h, c = carry
        gates = x_t @ w_ih.T + h @ w_hh.T + b_ih + b_hh
        i = jax.nn.sigmoid(gates[0:hidden])
        f = jax.nn.sigmoid(gates[hidden:2 * hidden])
        g = jnp.tanh(gates[2 * hidden:3 * hidden])
        o = jax.nn.sigmoid(gates[3 * hidden:4 * hidden])
        c = f * c + i * g
        h = o * jnp.tanh(c)
        return (h, c), h

    (h, _), hs = lax.scan(step, (jnp.zeros(hidden), jnp.zeros(hidden)), x)
    preds = hs @ w_lin.T + b_lin
    return preds[-1]


if __name__ == "__main__":
    input_size = 1
    hidden_layer_size = 100
    output_size = 1
    seq_len = 8

    key = jax.random.PRNGKey(0)
    k0, k1, k2, k3, k4, k5, k6 = jax.random.split(key, 7)
    bound = 1.0 / math.sqrt(hidden_layer_size)

    # Deterministic init mirroring PyTorch's uniform(-1/sqrt(H), 1/sqrt(H)).
    w_ih = jax.random.uniform(k0, (4 * hidden_layer_size, input_size), jnp.float32, -bound, bound)
    w_hh = jax.random.uniform(k1, (4 * hidden_layer_size, hidden_layer_size), jnp.float32, -bound, bound)
    b_ih = jax.random.uniform(k2, (4 * hidden_layer_size,), jnp.float32, -bound, bound)
    b_hh = jax.random.uniform(k3, (4 * hidden_layer_size,), jnp.float32, -bound, bound)
    w_lin = jax.random.uniform(k4, (output_size, hidden_layer_size), jnp.float32, -bound, bound)
    b_lin = jax.random.uniform(k5, (output_size,), jnp.float32, -bound, bound)

    # input_seq of shape (seq_len,); .view(len, 1, -1) => (seq_len, batch=1, input=1)
    input_seq = jax.random.normal(k6, (seq_len,), jnp.float32)
    x = input_seq.reshape(seq_len, input_size)

    out = lstm_forward(x, w_ih, w_hh, b_ih, b_hh, w_lin, b_lin)
    out = jax.block_until_ready(out)

    ref = lstm_reference(x, w_ih, w_hh, b_ih, b_hh, w_lin, b_lin)
    assert out.shape == (output_size,)
    assert jnp.allclose(out, ref, atol=1e-5, rtol=1e-5), (out, ref)

    print("KERNEL_OK")
</pallas_src>

<mosaic_0001>
module attributes {stable_mosaic.version = 11 : i64} {
  func.func @lstm_kernel(%arg0: memref<8x8xf32, #tpu.memory_space<vmem>>, %arg1: memref<8x512xf32, #tpu.memory_space<vmem>>, %arg2: memref<128x512xf32, #tpu.memory_space<vmem>>, %arg3: memref<1x512xf32, #tpu.memory_space<vmem>>, %arg4: memref<1x128xf32, #tpu.memory_space<vmem>>, %arg5: memref<1x1xf32, #tpu.memory_space<vmem>>, %arg6: memref<1x1xf32, #tpu.memory_space<vmem>>, %arg7: memref<8x512xf32, #tpu.memory_space<vmem>>) attributes {dimension_semantics = [], scalar_prefetch = 0 : i64, scratch_operands = 1 : i64, tpu.core_type = #tpu.core_type<tc>} {
    %c0 = arith.constant 0 : index
    %c0_0 = arith.constant 0 : index
    %0 = vector.load %arg0[%c0, %c0_0] : memref<8x8xf32, #tpu.memory_space<vmem>>, vector<8x8xf32>
    %c0_1 = arith.constant 0 : index
    %c0_2 = arith.constant 0 : index
    %1 = vector.load %arg1[%c0_1, %c0_2] : memref<8x512xf32, #tpu.memory_space<vmem>>, vector<8x512xf32>
    %cst = arith.constant dense<0.000000e+00> : vector<8x512xf32>
    %2 = tpu.matmul %0, %1, %cst {dimension_numbers = #tpu.dot_dimension_numbers<[1], [0], [0], [1], [0, 0, 1, 1], [], []>} : vector<8x8xf32>, vector<8x512xf32>, vector<8x512xf32> -> vector<8x512xf32>
    %c0_3 = arith.constant 0 : index
    %c0_4 = arith.constant 0 : index
    %3 = vector.load %arg3[%c0_3, %c0_4] : memref<1x512xf32, #tpu.memory_space<vmem>>, vector<1x512xf32>
    %4 = vector.broadcast %3 : vector<1x512xf32> to vector<8x512xf32>
    %5 = arith.addf %2, %4 : vector<8x512xf32>
    %c0_5 = arith.constant 0 : index
    %c0_6 = arith.constant 0 : index
    %6 = vector.load %arg7[%c0_5, %c0_6] : memref<8x512xf32, #tpu.memory_space<vmem>>, vector<8x512xf32>
    tpu.vector_store %arg7[%c0_5, %c0_6], %5 {strides = array<i32>} : memref<8x512xf32, #tpu.memory_space<vmem>>, vector<8x512xf32>,
    %c0_7 = arith.constant 0 : index
    %c0_8 = arith.constant 0 : index
    %7 = vector.load %arg2[%c0_7, %c0_8] : memref<128x512xf32, #tpu.memory_space<vmem>>, vector<128x512xf32>
    %cst_9 = arith.constant 0.000000e+00 : f32
    %8 = vector.broadcast %cst_9 : f32 to vector<1x128xf32>
    %cst_10 = arith.constant 0.000000e+00 : f32
    %9 = vector.broadcast %cst_10 : f32 to vector<1x128xf32>
    %c0_i32 = arith.constant 0 : i32
    %10 = arith.index_cast %c0_i32 : i32 to index
    %c0_11 = arith.constant 0 : index
    %11 = vector.load %arg7[%10, %c0_11] : memref<8x512xf32, #tpu.memory_space<vmem>>, vector<1x512xf32>
    %cst_12 = arith.constant dense<0.000000e+00> : vector<1x512xf32>
    %12 = tpu.matmul %8, %7, %cst_12 {dimension_numbers = #tpu.dot_dimension_numbers<[1], [0], [0], [1], [0, 0, 1, 1], [], []>} : vector<1x128xf32>, vector<128x512xf32>, vector<1x512xf32> -> vector<1x512xf32>
    %13 = arith.addf %11, %12 : vector<1x512xf32>
    %14 = vector.extract_strided_slice %13 {offsets = [0, 0], sizes = [1, 128], strides = [1, 1]} : vector<1x512xf32> to vector<1x128xf32>
    %15 = arith.negf %14 : vector<1x128xf32>
    %16 = math.exp %15 : vector<1x128xf32>
    %cst_13 = arith.constant 1.000000e+00 : f32
    %17 = vector.broadcast %cst_13 : f32 to vector<1x128xf32>
    %18 = arith.addf %17, %16 : vector<1x128xf32>
    %19 = arith.divf %17, %18 : vector<1x128xf32>
    %20 = vector.extract_strided_slice %13 {offsets = [0, 128], sizes = [1, 128], strides = [1, 1]} : vector<1x512xf32> to vector<1x128xf32>
    %21 = arith.negf %20 : vector<1x128xf32>
    %22 = math.exp %21 : vector<1x128xf32>
    %cst_14 = arith.constant 1.000000e+00 : f32
    %23 = vector.broadcast %cst_14 : f32 to vector<1x128xf32>
    %24 = arith.addf %23, %22 : vector<1x128xf32>
    %25 = arith.divf %23, %24 : vector<1x128xf32>
    %26 = vector.extract_strided_slice %13 {offsets = [0, 256], sizes = [1, 128], strides = [1, 1]} : vector<1x512xf32> to vector<1x128xf32>
    %27 = math.tanh %26 : vector<1x128xf32>
    %28 = vector.extract_strided_slice %13 {offsets = [0, 384], sizes = [1, 128], strides = [1, 1]} : vector<1x512xf32> to vector<1x128xf32>
    %29 = arith.negf %28 : vector<1x128xf32>
    %30 = math.exp %29 : vector<1x128xf32>
    %cst_15 = arith.constant 1.000000e+00 : f32
    %31 = vector.broadcast %cst_15 : f32 to vector<1x128xf32>
    %32 = arith.addf %31, %30 : vector<1x128xf32>
    %33 = arith.divf %31, %32 : vector<1x128xf32>
    %34 = arith.mulf %25, %9 : vector<1x128xf32>
    %35 = arith.mulf %19, %27 : vector<1x128xf32>
    %36 = arith.addf %34, %35 : vector<1x128xf32>
    %37 = math.tanh %36 : vector<1x128xf32>
    %38 = arith.mulf %33, %37 : vector<1x128xf32>
    %c1_i32 = arith.constant 1 : i32
    %39 = arith.index_cast %c1_i32 : i32 to index
    %c0_16 = arith.constant 0 : index
    %40 = vector.load %arg7[%39, %c0_16] : memref<8x512xf32, #tpu.memory_space<vmem>>, vector<1x512xf32>
    %cst_17 = arith.constant dense<0.000000e+00> : vector<1x512xf32>
    %41 = tpu.matmul %38, %7, %cst_17 {dimension_numbers = #tpu.dot_dimension_numbers<[1], [0], [0], [1], [0, 0, 1, 1], [], []>} : vector<1x128xf32>, vector<128x512xf32>, vector<1x512xf32> -> vector<1x512xf32>
    %42 = arith.addf %40, %41 : vector<1x512xf32>
    %43 = vector.extract_strided_slice %42 {offsets = [0, 0], sizes = [1, 128], strides = [1, 1]} : vector<1x512xf32> to vector<1x128xf32>
    %44 = arith.negf %43 : vector<1x128xf32>
    %45 = math.exp %44 : vector<1x128xf32>
    %cst_18 = arith.constant 1.000000e+00 : f32
    %46 = vector.broadcast %cst_18 : f32 to vector<1x128xf32>
    %47 = arith.addf %46, %45 : vector<1x128xf32>
    %48 = arith.divf %46, %47 : vector<1x128xf32>
    %49 = vector.extract_strided_slice %42 {offsets = [0, 128], sizes = [1, 128], strides = [1, 1]} : vector<1x512xf32> to vector<1x128xf32>
    %50 = arith.negf %49 : vector<1x128xf32>
    %51 = math.exp %50 : vector<1x128xf32>
    %cst_19 = arith.constant 1.000000e+00 : f32
    %52 = vector.broadcast %cst_19 : f32 to vector<1x128xf32>
    %53 = arith.addf %52, %51 : vector<1x128xf32>
    %54 = arith.divf %52, %53 : vector<1x128xf32>
    %55 = vector.extract_strided_slice %42 {offsets = [0, 256], sizes = [1, 128], strides = [1, 1]} : vector<1x512xf32> to vector<1x128xf32>
    %56 = math.tanh %55 : vector<1x128xf32>
    %57 = vector.extract_strided_slice %42 {offsets = [0, 384], sizes = [1, 128], strides = [1, 1]} : vector<1x512xf32> to vector<1x128xf32>
    %58 = arith.negf %57 : vector<1x128xf32>
    %59 = math.exp %58 : vector<1x128xf32>
    %cst_20 = arith.constant 1.000000e+00 : f32
    %60 = vector.broadcast %cst_20 : f32 to vector<1x128xf32>
    %61 = arith.addf %60, %59 : vector<1x128xf32>
    %62 = arith.divf %60, %61 : vector<1x128xf32>
    %63 = arith.mulf %54, %36 : vector<1x128xf32>
    %64 = arith.mulf %48, %56 : vector<1x128xf32>
    %65 = arith.addf %63, %64 : vector<1x128xf32>
    %66 = math.tanh %65 : vector<1x128xf32>
    %67 = arith.mulf %62, %66 : vector<1x128xf32>
    %c2_i32 = arith.constant 2 : i32
    %68 = arith.index_cast %c2_i32 : i32 to index
    %c0_21 = arith.constant 0 : index
    %69 = vector.load %arg7[%68, %c0_21] : memref<8x512xf32, #tpu.memory_space<vmem>>, vector<1x512xf32>
    %cst_22 = arith.constant dense<0.000000e+00> : vector<1x512xf32>
    %70 = tpu.matmul %67, %7, %cst_22 {dimension_numbers = #tpu.dot_dimension_numbers<[1], [0], [0], [1], [0, 0, 1, 1], [], []>} : vector<1x128xf32>, vector<128x512xf32>, vector<1x512xf32> -> vector<1x512xf32>
    %71 = arith.addf %69, %70 : vector<1x512xf32>
    %72 = vector.extract_strided_slice %71 {offsets = [0, 0], sizes = [1, 128], strides = [1, 1]} : vector<1x512xf32> to vector<1x128xf32>
    %73 = arith.negf %72 : vector<1x128xf32>
    %74 = math.exp %73 : vector<1x128xf32>
    %cst_23 = arith.constant 1.000000e+00 : f32
    %75 = vector.broadcast %cst_23 : f32 to vector<1x128xf32>
    %76 = arith.addf %75, %74 : vector<1x128xf32>
    %77 = arith.divf %75, %76 : vector<1x128xf32>
    %78 = vector.extract_strided_slice %71 {offsets = [0, 128], sizes = [1, 128], strides = [1, 1]} : vector<1x512xf32> to vector<1x128xf32>
    %79 = arith.negf %78 : vector<1x128xf32>
    %80 = math.exp %79 : vector<1x128xf32>
    %cst_24 = arith.constant 1.000000e+00 : f32
    %81 = vector.broadcast %cst_24 : f32 to vector<1x128xf32>
    %82 = arith.addf %81, %80 : vector<1x128xf32>
    %83 = arith.divf %81, %82 : vector<1x128xf32>
    %84 = vector.extract_strided_slice %71 {offsets = [0, 256], sizes = [1, 128], strides = [1, 1]} : vector<1x512xf32> to vector<1x128xf32>
    %85 = math.tanh %84 : vector<1x128xf32>
    %86 = vector.extract_strided_slice %71 {offsets = [0, 384], sizes = [1, 128], strides = [1, 1]} : vector<1x512xf32> to vector<1x128xf32>
    %87 = arith.negf %86 : vector<1x128xf32>
    %88 = math.exp %87 : vector<1x128xf32>
    %cst_25 = arith.constant 1.000000e+00 : f32
    %89 = vector.broadcast %cst_25 : f32 to vector<1x128xf32>
    %90 = arith.addf %89, %88 : vector<1x128xf32>
    %91 = arith.divf %89, %90 : vector<1x128xf32>
    %92 = arith.mulf %83, %65 : vector<1x128xf32>
    %93 = arith.mulf %77, %85 : vector<1x128xf32>
    %94 = arith.addf %92, %93 : vector<1x128xf32>
    %95 = math.tanh %94 : vector<1x128xf32>
    %96 = arith.mulf %91, %95 : vector<1x128xf32>
    %c3_i32 = arith.constant 3 : i32
    %97 = arith.index_cast %c3_i32 : i32 to index
    %c0_26 = arith.constant 0 : index
    %98 = vector.load %arg7[%97, %c0_26] : memref<8x512xf32, #tpu.memory_space<vmem>>, vector<1x512xf32>
    %cst_27 = arith.constant dense<0.000000e+00> : vector<1x512xf32>
    %99 = tpu.matmul %96, %7, %cst_27 {dimension_numbers = #tpu.dot_dimension_numbers<[1], [0], [0], [1], [0, 0, 1, 1], [], []>} : vector<1x128xf32>, vector<128x512xf32>, vector<1x512xf32> -> vector<1x512xf32>
    %100 = arith.addf %98, %99 : vector<1x512xf32>
    %101 = vector.extract_strided_slice %100 {offsets = [0, 0], sizes = [1, 128], strides = [1, 1]} : vector<1x512xf32> to vector<1x128xf32>
    %102 = arith.negf %101 : vector<1x128xf32>
    %103 = math.exp %102 : vector<1x128xf32>
    %cst_28 = arith.constant 1.000000e+00 : f32
    %104 = vector.broadcast %cst_28 : f32 to vector<1x128xf32>
    %105 = arith.addf %104, %103 : vector<1x128xf32>
    %106 = arith.divf %104, %105 : vector<1x128xf32>
    %107 = vector.extract_strided_slice %100 {offsets = [0, 128], sizes = [1, 128], strides = [1, 1]} : vector<1x512xf32> to vector<1x128xf32>
    %108 = arith.negf %107 : vector<1x128xf32>
    %109 = math.exp %108 : vector<1x128xf32>
    %cst_29 = arith.constant 1.000000e+00 : f32
    %110 = vector.broadcast %cst_29 : f32 to vector<1x128xf32>
    %111 = arith.addf %110, %109 : vector<1x128xf32>
    %112 = arith.divf %110, %111 : vector<1x128xf32>
    %113 = vector.extract_strided_slice %100 {offsets = [0, 256], sizes = [1, 128], strides = [1, 1]} : vector<1x512xf32> to vector<1x128xf32>
    %114 = math.tanh %113 : vector<1x128xf32>
    %115 = vector.extract_strided_slice %100 {offsets = [0, 384], sizes = [1, 128], strides = [1, 1]} : vector<1x512xf32> to vector<1x128xf32>
    %116 = arith.negf %115 : vector<1x128xf32>
    %117 = math.exp %116 : vector<1x128xf32>
    %cst_30 = arith.constant 1.000000e+00 : f32
    %118 = vector.broadcast %cst_30 : f32 to vector<1x128xf32>
    %119 = arith.addf %118, %117 : vector<1x128xf32>
    %120 = arith.divf %118, %119 : vector<1x128xf32>
    %121 = arith.mulf %112, %94 : vector<1x128xf32>
    %122 = arith.mulf %106, %114 : vector<1x128xf32>
    %123 = arith.addf %121, %122 : vector<1x128xf32>
    %124 = math.tanh %123 : vector<1x128xf32>
    %125 = arith.mulf %120, %124 : vector<1x128xf32>
    %c4_i32 = arith.constant 4 : i32
    %126 = arith.index_cast %c4_i32 : i32 to index
    %c0_31 = arith.constant 0 : index
    %127 = vector.load %arg7[%126, %c0_31] : memref<8x512xf32, #tpu.memory_space<vmem>>, vector<1x512xf32>
    %cst_32 = arith.constant dense<0.000000e+00> : vector<1x512xf32>
    %128 = tpu.matmul %125, %7, %cst_32 {dimension_numbers = #tpu.dot_dimension_numbers<[1], [0], [0], [1], [0, 0, 1, 1], [], []>} : vector<1x128xf32>, vector<128x512xf32>, vector<1x512xf32> -> vector<1x512xf32>
    %129 = arith.addf %127, %128 : vector<1x512xf32>
    %130 = vector.extract_strided_slice %129 {offsets = [0, 0], sizes = [1, 128], strides = [1, 1]} : vector<1x512xf32> to vector<1x128xf32>
    %131 = arith.negf %130 : vector<1x128xf32>
    %132 = math.exp %131 : vector<1x128xf32>
    %cst_33 = arith.constant 1.000000e+00 : f32
    %133 = vector.broadcast %cst_33 : f32 to vector<1x128xf32>
    %134 = arith.addf %133, %132 : vector<1x128xf32>
    %135 = arith.divf %133, %134 : vector<1x128xf32>
    %136 = vector.extract_strided_slice %129 {offsets = [0, 128], sizes = [1, 128], strides = [1, 1]} : vector<1x512xf32> to vector<1x128xf32>
    %137 = arith.negf %136 : vector<1x128xf32>
    %138 = math.exp %137 : vector<1x128xf32>
    %cst_34 = arith.constant 1.000000e+00 : f32
    %139 = vector.broadcast %cst_34 : f32 to vector<1x128xf32>
    %140 = arith.addf %139, %138 : vector<1x128xf32>
    %141 = arith.divf %139, %140 : vector<1x128xf32>
    %142 = vector.extract_strided_slice %129 {offsets = [0, 256], sizes = [1, 128], strides = [1, 1]} : vector<1x512xf32> to vector<1x128xf32>
    %143 = math.tanh %142 : vector<1x128xf32>
    %144 = vector.extract_strided_slice %129 {offsets = [0, 384], sizes = [1, 128], strides = [1, 1]} : vector<1x512xf32> to vector<1x128xf32>
    %145 = arith.negf %144 : vector<1x128xf32>
    %146 = math.exp %145 : vector<1x128xf32>
    %cst_35 = arith.constant 1.000000e+00 : f32
    %147 = vector.broadcast %cst_35 : f32 to vector<1x128xf32>
    %148 = arith.addf %147, %146 : vector<1x128xf32>
    %149 = arith.divf %147, %148 : vector<1x128xf32>
    %150 = arith.mulf %141, %123 : vector<1x128xf32>
    %151 = arith.mulf %135, %143 : vector<1x128xf32>
    %152 = arith.addf %150, %151 : vector<1x128xf32>
    %153 = math.tanh %152 : vector<1x128xf32>
    %154 = arith.mulf %149, %153 : vector<1x128xf32>
    %c5_i32 = arith.constant 5 : i32
    %155 = arith.index_cast %c5_i32 : i32 to index
    %c0_36 = arith.constant 0 : index
    %156 = vector.load %arg7[%155, %c0_36] : memref<8x512xf32, #tpu.memory_space<vmem>>, vector<1x512xf32>
    %cst_37 = arith.constant dense<0.000000e+00> : vector<1x512xf32>
    %157 = tpu.matmul %154, %7, %cst_37 {dimension_numbers = #tpu.dot_dimension_numbers<[1], [0], [0], [1], [0, 0, 1, 1], [], []>} : vector<1x128xf32>, vector<128x512xf32>, vector<1x512xf32> -> vector<1x512xf32>
    %158 = arith.addf %156, %157 : vector<1x512xf32>
    %159 = vector.extract_strided_slice %158 {offsets = [0, 0], sizes = [1, 128], strides = [1, 1]} : vector<1x512xf32> to vector<1x128xf32>
    %160 = arith.negf %159 : vector<1x128xf32>
    %161 = math.exp %160 : vector<1x128xf32>
    %cst_38 = arith.constant 1.000000e+00 : f32
    %162 = vector.broadcast %cst_38 : f32 to vector<1x128xf32>
    %163 = arith.addf %162, %161 : vector<1x128xf32>
    %164 = arith.divf %162, %163 : vector<1x128xf32>
    %165 = vector.extract_strided_slice %158 {offsets = [0, 128], sizes = [1, 128], strides = [1, 1]} : vector<1x512xf32> to vector<1x128xf32>
    %166 = arith.negf %165 : vector<1x128xf32>
    %167 = math.exp %166 : vector<1x128xf32>
    %cst_39 = arith.constant 1.000000e+00 : f32
    %168 = vector.broadcast %cst_39 : f32 to vector<1x128xf32>
    %169 = arith.addf %168, %167 : vector<1x128xf32>
    %170 = arith.divf %168, %169 : vector<1x128xf32>
    %171 = vector.extract_strided_slice %158 {offsets = [0, 256], sizes = [1, 128], strides = [1, 1]} : vector<1x512xf32> to vector<1x128xf32>
    %172 = math.tanh %171 : vector<1x128xf32>
    %173 = vector.extract_strided_slice %158 {offsets = [0, 384], sizes = [1, 128], strides = [1, 1]} : vector<1x512xf32> to vector<1x128xf32>
    %174 = arith.negf %173 : vector<1x128xf32>
    %175 = math.exp %174 : vector<1x128xf32>
    %cst_40 = arith.constant 1.000000e+00 : f32
    %176 = vector.broadcast %cst_40 : f32 to vector<1x128xf32>
    %177 = arith.addf %176, %175 : vector<1x128xf32>
    %178 = arith.divf %176, %177 : vector<1x128xf32>
    %179 = arith.mulf %170, %152 : vector<1x128xf32>
    %180 = arith.mulf %164, %172 : vector<1x128xf32>
    %181 = arith.addf %179, %180 : vector<1x128xf32>
    %182 = math.tanh %181 : vector<1x128xf32>
    %183 = arith.mulf %178, %182 : vector<1x128xf32>
    %c6_i32 = arith.constant 6 : i32
    %184 = arith.index_cast %c6_i32 : i32 to index
    %c0_41 = arith.constant 0 : index
    %185 = vector.load %arg7[%184, %c0_41] : memref<8x512xf32, #tpu.memory_space<vmem>>, vector<1x512xf32>
    %cst_42 = arith.constant dense<0.000000e+00> : vector<1x512xf32>
    %186 = tpu.matmul %183, %7, %cst_42 {dimension_numbers = #tpu.dot_dimension_numbers<[1], [0], [0], [1], [0, 0, 1, 1], [], []>} : vector<1x128xf32>, vector<128x512xf32>, vector<1x512xf32> -> vector<1x512xf32>
    %187 = arith.addf %185, %186 : vector<1x512xf32>
    %188 = vector.extract_strided_slice %187 {offsets = [0, 0], sizes = [1, 128], strides = [1, 1]} : vector<1x512xf32> to vector<1x128xf32>
    %189 = arith.negf %188 : vector<1x128xf32>
    %190 = math.exp %189 : vector<1x128xf32>
    %cst_43 = arith.constant 1.000000e+00 : f32
    %191 = vector.broadcast %cst_43 : f32 to vector<1x128xf32>
    %192 = arith.addf %191, %190 : vector<1x128xf32>
    %193 = arith.divf %191, %192 : vector<1x128xf32>
    %194 = vector.extract_strided_slice %187 {offsets = [0, 128], sizes = [1, 128], strides = [1, 1]} : vector<1x512xf32> to vector<1x128xf32>
    %195 = arith.negf %194 : vector<1x128xf32>
    %196 = math.exp %195 : vector<1x128xf32>
    %cst_44 = arith.constant 1.000000e+00 : f32
    %197 = vector.broadcast %cst_44 : f32 to vector<1x128xf32>
    %198 = arith.addf %197, %196 : vector<1x128xf32>
    %199 = arith.divf %197, %198 : vector<1x128xf32>
    %200 = vector.extract_strided_slice %187 {offsets = [0, 256], sizes = [1, 128], strides = [1, 1]} : vector<1x512xf32> to vector<1x128xf32>
    %201 = math.tanh %200 : vector<1x128xf32>
    %202 = vector.extract_strided_slice %187 {offsets = [0, 384], sizes = [1, 128], strides = [1, 1]} : vector<1x512xf32> to vector<1x128xf32>
    %203 = arith.negf %202 : vector<1x128xf32>
    %204 = math.exp %203 : vector<1x128xf32>
    %cst_45 = arith.constant 1.000000e+00 : f32
    %205 = vector.broadcast %cst_45 : f32 to vector<1x128xf32>
    %206 = arith.addf %205, %204 : vector<1x128xf32>
    %207 = arith.divf %205, %206 : vector<1x128xf32>
    %208 = arith.mulf %199, %181 : vector<1x128xf32>
    %209 = arith.mulf %193, %201 : vector<1x128xf32>
    %210 = arith.addf %208, %209 : vector<1x128xf32>
    %211 = math.tanh %210 : vector<1x128xf32>
    %212 = arith.mulf %207, %211 : vector<1x128xf32>
    %c7_i32 = arith.constant 7 : i32
    %213 = arith.index_cast %c7_i32 : i32 to index
    %c0_46 = arith.constant 0 : index
    %214 = vector.load %arg7[%213, %c0_46] : memref<8x512xf32, #tpu.memory_space<vmem>>, vector<1x512xf32>
    %cst_47 = arith.constant dense<0.000000e+00> : vector<1x512xf32>
    %215 = tpu.matmul %212, %7, %cst_47 {dimension_numbers = #tpu.dot_dimension_numbers<[1], [0], [0], [1], [0, 0, 1, 1], [], []>} : vector<1x128xf32>, vector<128x512xf32>, vector<1x512xf32> -> vector<1x512xf32>
    %216 = arith.addf %214, %215 : vector<1x512xf32>
    %217 = vector.extract_strided_slice %216 {offsets = [0, 0], sizes = [1, 128], strides = [1, 1]} : vector<1x512xf32> to vector<1x128xf32>
    %218 = arith.negf %217 : vector<1x128xf32>
    %219 = math.exp %218 : vector<1x128xf32>
    %cst_48 = arith.constant 1.000000e+00 : f32
    %220 = vector.broadcast %cst_48 : f32 to vector<1x128xf32>
    %221 = arith.addf %220, %219 : vector<1x128xf32>
    %222 = arith.divf %220, %221 : vector<1x128xf32>
    %223 = vector.extract_strided_slice %216 {offsets = [0, 128], sizes = [1, 128], strides = [1, 1]} : vector<1x512xf32> to vector<1x128xf32>
    %224 = arith.negf %223 : vector<1x128xf32>
    %225 = math.exp %224 : vector<1x128xf32>
    %cst_49 = arith.constant 1.000000e+00 : f32
    %226 = vector.broadcast %cst_49 : f32 to vector<1x128xf32>
    %227 = arith.addf %226, %225 : vector<1x128xf32>
    %228 = arith.divf %226, %227 : vector<1x128xf32>
    %229 = vector.extract_strided_slice %216 {offsets = [0, 256], sizes = [1, 128], strides = [1, 1]} : vector<1x512xf32> to vector<1x128xf32>
    %230 = math.tanh %229 : vector<1x128xf32>
    %231 = vector.extract_strided_slice %216 {offsets = [0, 384], sizes = [1, 128], strides = [1, 1]} : vector<1x512xf32> to vector<1x128xf32>
    %232 = arith.negf %231 : vector<1x128xf32>
    %233 = math.exp %232 : vector<1x128xf32>
    %cst_50 = arith.constant 1.000000e+00 : f32
    %234 = vector.broadcast %cst_50 : f32 to vector<1x128xf32>
    %235 = arith.addf %234, %233 : vector<1x128xf32>
    %236 = arith.divf %234, %235 : vector<1x128xf32>
    %237 = arith.mulf %228, %210 : vector<1x128xf32>
    %238 = arith.mulf %222, %230 : vector<1x128xf32>
    %239 = arith.addf %237, %238 : vector<1x128xf32>
    %240 = math.tanh %239 : vector<1x128xf32>
    %241 = arith.mulf %236, %240 : vector<1x128xf32>
    %c8_i32 = arith.constant 8 : i32
    %c0_51 = arith.constant 0 : index
    %c0_52 = arith.constant 0 : index
    %242 = vector.load %arg4[%c0_51, %c0_52] : memref<1x128xf32, #tpu.memory_space<vmem>>, vector<1x128xf32>
    %243 = arith.mulf %241, %242 : vector<1x128xf32>
    %cst_53 = arith.constant dense<0.000000e+00> : vector<1xf32>
    %244 = vector.multi_reduction <add>, %243, %cst_53 [1] : vector<1x128xf32> to vector<1xf32>
    %245 = vector.shape_cast %244 : vector<1xf32> to vector<1x1xf32>
    %c0_54 = arith.constant 0 : index
    %c0_55 = arith.constant 0 : index
    %246 = vector.load %arg5[%c0_54, %c0_55] : memref<1x1xf32, #tpu.memory_space<vmem>>, vector<1x1xf32>
    %247 = arith.addf %245, %246 : vector<1x1xf32>
    %c0_56 = arith.constant 0 : index
    %c0_57 = arith.constant 0 : index
    %248 = vector.load %arg6[%c0_56, %c0_57] : memref<1x1xf32, #tpu.memory_space<vmem>>, vector<1x1xf32>
    tpu.vector_store %arg6[%c0_56, %c0_57], %247 {strides = array<i32>} : memref<1x1xf32, #tpu.memory_space<vmem>>, vector<1x1xf32>,
    return
  }
}

</mosaic_0001>

<bundles_post_ra>
// kernel: tpu_custom_call.1
= control target key start
LH: loop header
LB: loop body
LE: loop exit
PB: predicated region body
PF: predicated region fallthrough
CT: control target
= control target key end

     0   :  { %s2794_s0 = inlined_call_operand.hbm [shape: f32[8,8], index: 0, kind: input, shape index: {}]   ;;  %s2795_s1 = inlined_call_operand.hbm [shape: f32[8,512], index: 1, kind: input, shape index: {}]   ;;  %s2796_s2 = inlined_call_operand.hbm [shape: f32[128,512], index: 2, kind: input, shape index: {}]   ;;  %s2797_s3 = inlined_call_operand.vmem [shape: f32[1,512], index: 3, kind: input, shape index: {}]   ;;  %s2798_s4 = inlined_call_operand.vmem [shape: f32[1,128], index: 4, kind: input, shape index: {}]   ;;  %s2799_s5 = inlined_call_operand.<no memory space> [shape: f32[1,1], index: 5, kind: input, shape index: {}]   ;;  %s2800_s6 = inlined_call_operand.hbm [shape: f32[1,1], index: 6, kind: output, shape index: {}]  }
   0x1   :  { %v11_v0 = vstv %s2799_s5 }
   0x2   :  { %12 = vst [vmem:[#allocation3] sm:$0x1] %v11_v0 }
   0x3   :  { %13 = vsyncpa [#allocation5], 0 }
   0x4   :  { %14 = vsyncpa [#allocation8], 0  ;;  %s32_s25 = sshll.u32 %s2795_s1, 4  ;;  %s33_s25 = int_to_ptr.hbm [resolvable:$true] %s32_s25 }
   0x5   :  { %15 = vsyncpa [#allocation6], 0  ;;  %s1906_s26 = smov [#allocation7]   ;;  %s21_s30 = sshll.u32 %s2794_s0, 4  ;;  %s22_s30 = int_to_ptr.hbm [resolvable:$true] %s21_s30 }
   0x6   :  { %s34_s27 = sshll.u32 %s1906_s26, 4  ;;  %s1907_s7 = smov [#allocation4]   ;;  %s35_s27 = int_to_ptr.vmem [resolvable:$true] %s34_s27 }
   0x7   :  { %37 = dma.hbm_to_vmem [thread:$0]  %s33_s25, 512, %s35_s27, [#allocation8]  }
   0x8   :  { %s23_s5 = sshll.u32 %s1907_s7, 4  ;;  %s42_s10 = sshll.u32 %s2796_s2, 4  ;;  %s24_s5 = int_to_ptr.vmem [resolvable:$true] %s23_s5  ;;  %s43_s10 = int_to_ptr.hbm [resolvable:$true] %s42_s10 }
   0x9   :  { %26 = dma.hbm_to_vmem [thread:$0]  %s22_s30, 128, %s24_s5, [#allocation5]  }
   0xa   :  { %s1908_s1 = smov [#allocation9]   ;;  %s1909_s12 = smov 512  }
   0xb   :  { %s44_s11 = sshll.u32 %s1908_s1, 4  ;;  %s1910_s13 = smov 32   ;;  %s45_s11 = int_to_ptr.vmem [resolvable:$true] %s44_s11 }
   0xc   :  { %50 = dma.hbm_to_vmem [thread:$0]  %s43_s10, 8192, %s45_s11, [#allocation8], %s1909_s12, %s1909_s12, %s1910_s13  }
   0xd   :  { %1900 = dma.done.wait [#allocation5], 128  }
   0xe   :  { %1901 = vsyncadd [#allocation5], 4294967168 }
   0xf   :  { %1902 = dma.done.wait [#allocation8], 8704  }
  0x10   :  { %1903 = vsyncadd [#allocation8], 4294958592  ;;  %v72_v1 = vld [vmem:[#allocation7 + $0x10] sm:$0xff]  ;;  %v73_v2 = vld [vmem:[#allocation7 + $0x18] sm:$0xff]  ;;  %vm84_vm0 = vcmask 64512   ;;  %vm324_vm1 = vcmask 1040384  }
  0x11   :  { %v1960_v3 = vld [vmem:[#allocation9 + $0x1f0] sm:$0xff]  ;;  %143 = vmatpush.msra.mxu2 %v72_v1  ;;  %163 = vmatpush.msra.mxu3 %v73_v2  ;;  %v1962_v4 = vld [vmem:[#allocation9 + $0x1f8] sm:$0xff]  ;;  %v71_v7 = vld [vmem:[#allocation7 + $0x8] sm:$0xff]  ;;  %v1911_v1 = vmov 0.0   ;;  %vm326_vm2 = vcmask 1042434   ;;  %vm328_vm3 = vcmask 1041408  }
  0x12   :  { %v1964_v5 = vld [vmem:[#allocation9 + $0x1d0] sm:$0xff]  ;;  %v1966_v6 = vld [vmem:[#allocation9 + $0x1d8] sm:$0xff]  ;;  %123 = vmatpush.msra.mxu1 %v71_v7  ;;  %v1974_v10 = vld [vmem:[#allocation9 + $0x1e8] sm:$0xff]  ;;  %s1912_s15 = smov [#allocation10]   ;;  %s1566_s19 = sshll.u32 %s2800_s6, 4  ;;  %s1567_s19 = int_to_ptr.hbm [resolvable:$true] %s1566_s19 }
  0x13   :  { %277 = vmatpush.msrb.mxu2 %v1960_v3  ;;  %297 = vmatpush.msrb.mxu3 %v1962_v4  ;;  %v1970_v8 = vld [vmem:[#allocation9 + $0x1b0] sm:$0xff]  ;;  %v1972_v9 = vld [vmem:[#allocation9 + $0x1b8] sm:$0xff]  ;;  %v70_v11 = vld [vmem:[#allocation7] sm:$0xff]  ;;  %s1564_s16 = sshll.u32 %s1912_s15, 4  ;;  %s1565_s16 = int_to_ptr.vmem [resolvable:$true] %s1564_s16 }
  0x14   :  { %v1978_v12 = vld [vmem:[#allocation9 + $0x1e0] sm:$0xff]  ;;  %v1980_v13 = vld [vmem:[#allocation9 + $0x1c8] sm:$0xff]  ;;  %257 = vmatpush.msrb.mxu1 %v1974_v10  ;;  %v1983_v14 = vld [vmem:[#allocation9 + $0x190] sm:$0xff]  ;;  %103 = vmatpush.msra.mxu0 %v70_v11 }
  0x15   :  { %278 = vmatpush.msrb.mxu2 %v1964_v5  ;;  %298 = vmatpush.msrb.mxu3 %v1966_v6  ;;  %v1985_v15 = vld [vmem:[#allocation9 + $0x198] sm:$0xff]  ;;  %v1989_v16 = vld [vmem:[#allocation9 + $0x1c0] sm:$0xff]  ;;  %v1991_v17 = vld [vmem:[#allocation9 + $0x1a8] sm:$0xff] }
  0x16   :  { %237 = vmatpush.msrb.mxu0 %v1978_v12  ;;  %258 = vmatpush.msrb.mxu1 %v1980_v13  ;;  %v1995_v18 = vld [vmem:[#allocation9 + $0x170] sm:$0xff]  ;;  %v1997_v19 = vld [vmem:[#allocation9 + $0x178] sm:$0xff]  ;;  %v2001_v20 = vld [vmem:[#allocation9 + $0x1a0] sm:$0xff] }
  0x17   :  { %279 = vmatpush.msrb.mxu2 %v1970_v8  ;;  %299 = vmatpush.msrb.mxu3 %v1972_v9  ;;  %v2003_v21 = vld [vmem:[#allocation9 + $0x188] sm:$0xff]  ;;  %v2007_v22 = vld [vmem:[#allocation9 + $0x150] sm:$0xff]  ;;  %v2009_v23 = vld [vmem:[#allocation9 + $0x158] sm:$0xff] }
  0x18   :  { %238 = vmatpush.msrb.mxu0 %v1989_v16  ;;  %259 = vmatpush.msrb.mxu1 %v1991_v17  ;;  %v2013_v24 = vld [vmem:[#allocation9 + $0x180] sm:$0xff]  ;;  %v2015_v25 = vld [vmem:[#allocation9 + $0x168] sm:$0xff]  ;;  %v2019_v26 = vld [vmem:[#allocation9 + $0x130] sm:$0xff] }
  0x19   :  { %280 = vmatpush.msrb.mxu2 %v1983_v14  ;;  %300 = vmatpush.msrb.mxu3 %v1985_v15  ;;  %v2021_v27 = vld [vmem:[#allocation9 + $0x138] sm:$0xff]  ;;  %v2025_v28 = vld [vmem:[#allocation9 + $0x160] sm:$0xff]  ;;  %v2027_v29 = vld [vmem:[#allocation9 + $0x148] sm:$0xff] }
  0x1a   :  { %239 = vmatpush.msrb.mxu0 %v2001_v20  ;;  %260 = vmatpush.msrb.mxu1 %v2003_v21  ;;  %v2031_v30 = vld [vmem:[#allocation9 + $0x110] sm:$0xff]  ;;  %v2033_v31 = vld [vmem:[#allocation9 + $0x118] sm:$0xff]  ;;  %v2037_v32 = vld [vmem:[#allocation9 + $0x140] sm:$0xff] }
  0x1b   :  { %281 = vmatpush.msrb.mxu2 %v1995_v18  ;;  %301 = vmatpush.msrb.mxu3 %v1997_v19  ;;  %v2039_v33 = vld [vmem:[#allocation9 + $0x128] sm:$0xff]  ;;  %v2043_v34 = vld [vmem:[#allocation9 + $0xf0] sm:$0xff]  ;;  %v2045_v35 = vld [vmem:[#allocation9 + $0xf8] sm:$0xff] }
  0x1c   :  { %240 = vmatpush.msrb.mxu0 %v2013_v24  ;;  %261 = vmatpush.msrb.mxu1 %v2015_v25  ;;  %v2049_v36 = vld [vmem:[#allocation9 + $0x120] sm:$0xff]  ;;  %v2051_v37 = vld [vmem:[#allocation9 + $0x108] sm:$0xff]  ;;  %v2055_v38 = vld [vmem:[#allocation9 + $0xd0] sm:$0xff] }
  0x1d   :  { %282 = vmatpush.msrb.mxu2 %v2007_v22  ;;  %302 = vmatpush.msrb.mxu3 %v2009_v23  ;;  %2908 = vst [vmem:[#allocation14_spill] sm:$0xff] %v2055_v38  ;;  %v2057_v39 = vld [vmem:[#allocation9 + $0xd8] sm:$0xff]  ;;  %v2061_v40 = vld [vmem:[#allocation9 + $0x100] sm:$0xff]  ;;  %v2063_v41 = vld [vmem:[#allocation9 + $0xe8] sm:$0xff] }
  0x1e   :  { %241 = vmatpush.msrb.mxu0 %v2025_v28  ;;  %262 = vmatpush.msrb.mxu1 %v2027_v29  ;;  %2909 = vst [vmem:[#allocation15_spill] sm:$0xff] %v2057_v39  ;;  %v2067_v42 = vld [vmem:[#allocation9 + $0xb0] sm:$0xff]  ;;  %v2069_v43 = vld [vmem:[#allocation9 + $0xb8] sm:$0xff]  ;;  %v2081_v47 = vld [vmem:[#allocation9 + $0xe0] sm:$0xff] }
  0x1f   :  { %283 = vmatpush.msrb.mxu2 %v2019_v26  ;;  %303 = vmatpush.msrb.mxu3 %v2021_v27  ;;  %2910 = vst [vmem:[#allocation16_spill] sm:$0xff] %v2067_v42  ;;  %v69_v44 = vld [vmem:[#allocation4] sm:$0xff]  ;;  %v2075_v45 = vld [vmem:[#allocation9 + $0x90] sm:$0xff]  ;;  %v2083_v48 = vld [vmem:[#allocation9 + $0xc8] sm:$0xff] }
  0x20   :  { %242 = vmatpush.msrb.mxu0 %v2037_v32  ;;  %263 = vmatpush.msrb.mxu1 %v2039_v33  ;;  %2911 = vst [vmem:[#allocation17_spill] sm:$0xff] %v2069_v43  ;;  %v2077_v46 = vld [vmem:[#allocation9 + $0x98] sm:$0xff]  ;;  %v2087_v49 = vld [vmem:[#allocation9 + $0x70] sm:$0xff]  ;;  %v2093_v51 = vld [vmem:[#allocation9 + $0xc0] sm:$0xff] }
  0x21   :  { %284 = vmatpush.msrb.mxu2 %v2031_v30  ;;  %304 = vmatpush.msrb.mxu3 %v2033_v31  ;;  %2912 = vst [vmem:[#allocation18_spill] sm:$0xff] %v2075_v45  ;;  %v2089_v50 = vld [vmem:[#allocation9 + $0x78] sm:$0xff]  ;;  %v2095_v52 = vld [vmem:[#allocation9 + $0xa8] sm:$0xff]  ;;  %v2099_v53 = vld [vmem:[#allocation9 + $0x50] sm:$0xff] }
  0x22   :  { %243 = vmatpush.msrb.mxu0 %v2049_v36  ;;  %264 = vmatpush.msrb.mxu1 %v2051_v37  ;;  %2913 = vst [vmem:[#allocation19_spill] sm:$0xff] %v2077_v46  ;;  %v2101_v54 = vld [vmem:[#allocation9 + $0x58] sm:$0xff]  ;;  %v2105_v55 = vld [vmem:[#allocation9 + $0xa0] sm:$0xff]  ;;  %v2107_v56 = vld [vmem:[#allocation9 + $0x88] sm:$0xff] }
  0x23   :  { %285 = vmatpush.msrb.mxu2 %v2043_v34  ;;  %305 = vmatpush.msrb.mxu3 %v2045_v35  ;;  %2914 = vst [vmem:[#allocation20_spill] sm:$0xff] %v2087_v49  ;;  %v2111_v57 = vld [vmem:[#allocation9 + $0x30] sm:$0xff]  ;;  %v2113_v58 = vld [vmem:[#allocation9 + $0x38] sm:$0xff]  ;;  %v2119_v59 = vld [vmem:[#allocation9 + $0x80] sm:$0xff] }
  0x24   :  { %244 = vmatpush.msrb.mxu0 %v2061_v40  ;;  %265 = vmatpush.msrb.mxu1 %v2063_v41  ;;  %2915 = vst [vmem:[#allocation21_spill] sm:$0xff] %v2089_v50  ;;  %v2121_v60 = vld [vmem:[#allocation9 + $0x68] sm:$0xff]  ;;  %v2125_v61 = vld [vmem:[#allocation9 + $0x10] sm:$0xff]  ;;  %v2127_v62 = vld [vmem:[#allocation9 + $0x18] sm:$0xff] }
  0x25   :  { %286 = vmatpush.msrb.mxu2 %v2055_v38  ;;  %306 = vmatpush.msrb.mxu3 %v2057_v39  ;;  %2916 = vst [vmem:[#allocation22_spill] sm:$0xff] %v2095_v52  ;;  %v2133_v63 = vld [vmem:[#allocation9 + $0x60] sm:$0xff]  ;;  %v2135_v0 = vld [vmem:[#allocation9 + $0x48] sm:$0xff] }
  0x26   :  { %1579 = vmatmul.msk.f32.vlgmr.msra.gmra.mxu2 %vm84_vm0, %v69_v44  ;;  %1580 = vmatmul.msk.f32.vlgmr.msra.gmra.mxu3 %vm84_vm0, %v69_v44  ;;  %2917 = vst [vmem:[#allocation23_spill] sm:$0xff] %v2099_v53  ;;  %v2139_v2 = vld [vmem:[#allocation9 + $0x40] sm:$0xff]  ;;  %v2141_v7 = vld [vmem:[#allocation9 + $0x28] sm:$0xff] }
  0x27   :  { %287 = vmatpush.msrb.mxu2 %v2067_v42  ;;  %307 = vmatpush.msrb.mxu3 %v2069_v43  ;;  %2918 = vst [vmem:[#allocation24_spill] sm:$0xff] %v2101_v54  ;;  %v2145_v11 = vld [vmem:[#allocation9 + $0x20] sm:$0xff] }
  0x28   :  { %245 = vmatpush.msrb.mxu0 %v2081_v47  ;;  %266 = vmatpush.msrb.mxu1 %v2083_v48  ;;  %2919 = vst [vmem:[#allocation25_spill] sm:$0xff] %v2105_v55 }
  0x29   :  { %288 = vmatpush.msrb.mxu2 %v2075_v45  ;;  %308 = vmatpush.msrb.mxu3 %v2077_v46  ;;  %2920 = vst [vmem:[#allocation26_spill] sm:$0xff] %v2107_v56 }
  0x2a   :  { %246 = vmatpush.msrb.mxu0 %v2093_v51  ;;  %267 = vmatpush.msrb.mxu1 %v2095_v52  ;;  %2921 = vst [vmem:[#allocation27_spill] sm:$0xff] %v2111_v57 }
  0x2b   :  { %289 = vmatpush.msrb.mxu2 %v2087_v49  ;;  %309 = vmatpush.msrb.mxu3 %v2089_v50  ;;  %2922 = vst [vmem:[#allocation28_spill] sm:$0xff] %v2113_v58 }
  0x2c   :  { %247 = vmatpush.msrb.mxu0 %v2105_v55  ;;  %268 = vmatpush.msrb.mxu1 %v2107_v56  ;;  %2923 = vst [vmem:[#allocation29_spill] sm:$0xff] %v2119_v59 }
  0x2d   :  { %290 = vmatpush.msrb.mxu2 %v2099_v53  ;;  %310 = vmatpush.msrb.mxu3 %v2101_v54  ;;  %2924 = vst [vmem:[#allocation30_spill] sm:$0xff] %v2121_v60 }
  0x2e   :  { %2925 = vst [vmem:[#allocation31_spill] sm:$0xff] %v2125_v61  ;;  %1577 = vmatmul.msk.f32.vlgmr.msra.gmra.mxu0 %vm84_vm0, %v69_v44  ;;  %1578 = vmatmul.msk.f32.vlgmr.msra.gmra.mxu1 %vm84_vm0, %v69_v44  ;;  %v2147_v44 = vld [vmem:[#allocation9 + $0x8] sm:$0xff] }
  0x2f   :  { %291 = vmatpush.msrb.mxu2 %v2111_v57  ;;  %311 = vmatpush.msrb.mxu3 %v2113_v58  ;;  %2926 = vst [vmem:[#allocation32_spill] sm:$0xff] %v2127_v62 }
  0x30   :  { %248 = vmatpush.msrb.mxu0 %v2119_v59  ;;  %269 = vmatpush.msrb.mxu1 %v2121_v60  ;;  %2927 = vst [vmem:[#allocation33_spill] sm:$0xff] %v2133_v63 }
  0x31   :  { %2928 = vst [vmem:[#allocation34_spill] sm:$0xff] %v2135_v0  ;;  %292 = vmatpush.msrb.mxu2 %v2125_v61  ;;  %312 = vmatpush.msrb.mxu3 %v2127_v62  ;;  %v2153_v62 = vld [vmem:[#allocation9] sm:$0xff] }
  0x32   :  { %293 = vmatmul.f32.vlgmr.msrb.gmra.mxu2 %v1911_v1  ;;  %313 = vmatmul.f32.vlgmr.msrb.gmra.mxu3 %v1911_v1  ;;  %2929 = vst [vmem:[#allocation35_spill] sm:$0xff] %v2139_v2 }
  0x33   :  { %2930 = vst [vmem:[#allocation36_spill] sm:$0xff] %v2141_v7  ;;  %249 = vmatpush.msrb.mxu0 %v2133_v63  ;;  %270 = vmatpush.msrb.mxu1 %v2135_v0 }
  0x34   :  { %2931 = vst [vmem:[#allocation37_spill] sm:$0xff] %v2145_v11  ;;  %444 = vmatpush.msra.mxu2 %v1960_v3  ;;  %464 = vmatpush.msra.mxu3 %v1962_v4 }
  0x35   :  { %2932 = vst [vmem:[#allocation38_spill] sm:$0xff] %v2147_v44  ;;  %250 = vmatpush.msrb.mxu0 %v2139_v2  ;;  %271 = vmatpush.msrb.mxu1 %v2141_v7 }
  0x36   :  { %2933 = vst [vmem:[#allocation39_spill] sm:$0xff] %v2153_v62  ;;  %445 = vmatpush.msra.mxu2 %v1964_v5  ;;  %465 = vmatpush.msra.mxu3 %v1966_v6 }
  0x37   :  { %251 = vmatpush.msrb.mxu0 %v2145_v11  ;;  %272 = vmatpush.msrb.mxu1 %v2147_v44 }
  0x38   :  { %273 = vmatmul.f32.vlgmr.msrb.gmra.mxu1 %v1911_v1  ;;  %446 = vmatpush.msra.mxu2 %v1970_v8 }
  0x39   :  { %252 = vmatpush.msrb.mxu0 %v2153_v62  ;;  %424 = vmatpush.msra.mxu1 %v1974_v10 }
  0x3a   :  { %253 = vmatmul.f32.vlgmr.msrb.gmra.mxu0 %v1911_v1  ;;  %466 = vmatpush.msra.mxu3 %v1972_v9  ;;  %v2934_v1 = vld [vmem:[#allocation32_spill] sm:$0xff] }
  0x3b   :  { %404 = vmatpush.msra.mxu0 %v1978_v12  ;;  %425 = vmatpush.msra.mxu1 %v1980_v13 }
  0x3c   :  { %447 = vmatpush.msra.mxu2 %v1983_v14  ;;  %467 = vmatpush.msra.mxu3 %v1985_v15 }
  0x3d   :  { %405 = vmatpush.msra.mxu0 %v1989_v16  ;;  %426 = vmatpush.msra.mxu1 %v1991_v17 }
  0x3e   :  { %448 = vmatpush.msra.mxu2 %v1995_v18  ;;  %468 = vmatpush.msra.mxu3 %v1997_v19 }
  0x3f   :  { %406 = vmatpush.msra.mxu0 %v2001_v20  ;;  %427 = vmatpush.msra.mxu1 %v2003_v21 }
  0x40   :  { %449 = vmatpush.msra.mxu2 %v2007_v22  ;;  %469 = vmatpush.msra.mxu3 %v2009_v23 }
  0x41   :  { %407 = vmatpush.msra.mxu0 %v2013_v24  ;;  %428 = vmatpush.msra.mxu1 %v2015_v25 }
  0x42   :  { %450 = vmatpush.msra.mxu2 %v2019_v26  ;;  %470 = vmatpush.msra.mxu3 %v2021_v27 }
  0x43   :  { %408 = vmatpush.msra.mxu0 %v2025_v28  ;;  %429 = vmatpush.msra.mxu1 %v2027_v29 }
  0x44   :  { %451 = vmatpush.msra.mxu2 %v2031_v30  ;;  %471 = vmatpush.msra.mxu3 %v2033_v31 }
  0x45   :  { %409 = vmatpush.msra.mxu0 %v2037_v32  ;;  %430 = vmatpush.msra.mxu1 %v2039_v33 }
  0x46   :  { %452 = vmatpush.msra.mxu2 %v2043_v34  ;;  %472 = vmatpush.msra.mxu3 %v2045_v35 }
  0x47   :  { %410 = vmatpush.msra.mxu0 %v2049_v36  ;;  %431 = vmatpush.msra.mxu1 %v2051_v37 }
  0x48   :  { %453 = vmatpush.msra.mxu2 %v2055_v38  ;;  %473 = vmatpush.msra.mxu3 %v2057_v39 }
  0x49   :  { %411 = vmatpush.msra.mxu0 %v2061_v40  ;;  %432 = vmatpush.msra.mxu1 %v2063_v41 }
  0x4a   :  { %454 = vmatpush.msra.mxu2 %v2067_v42  ;;  %474 = vmatpush.msra.mxu3 %v2069_v43 }
  0x4b   :  { %412 = vmatpush.msra.mxu0 %v2081_v47  ;;  %433 = vmatpush.msra.mxu1 %v2083_v48 }
  0x4c   :  { %455 = vmatpush.msra.mxu2 %v2075_v45  ;;  %475 = vmatpush.msra.mxu3 %v2077_v46 }
  0x4d   :  { %413 = vmatpush.msra.mxu0 %v2093_v51  ;;  %434 = vmatpush.msra.mxu1 %v2095_v52 }
  0x4e   :  { %456 = vmatpush.msra.mxu2 %v2087_v49  ;;  %476 = vmatpush.msra.mxu3 %v2089_v50 }
  0x4f   :  { %414 = vmatpush.msra.mxu0 %v2105_v55  ;;  %435 = vmatpush.msra.mxu1 %v2107_v56 }
  0x50   :  { %457 = vmatpush.msra.mxu2 %v2099_v53  ;;  %477 = vmatpush.msra.mxu3 %v2101_v54 }
  0x51   :  { %415 = vmatpush.msra.mxu0 %v2119_v59  ;;  %436 = vmatpush.msra.mxu1 %v2121_v60 }
  0x52   :  { %458 = vmatpush.msra.mxu2 %v2111_v57  ;;  %478 = vmatpush.msra.mxu3 %v2113_v58 }
  0x53   :  { %416 = vmatpush.msra.mxu0 %v2133_v63  ;;  %437 = vmatpush.msra.mxu1 %v2135_v0 }
  0x54   :  { %459 = vmatpush.msra.mxu2 %v2125_v61  ;;  %479 = vmatpush.msra.mxu3 %v2934_v1 }
  0x55   :  { %417 = vmatpush.msra.mxu0 %v2139_v2  ;;  %438 = vmatpush.msra.mxu1 %v2141_v7 }
  0x56   :  { %608 = vmatpush.msrb.mxu2 %v1960_v3  ;;  %628 = vmatpush.msrb.mxu3 %v1962_v4 }
  0x57   :  { %418 = vmatpush.msra.mxu0 %v2145_v11  ;;  %439 = vmatpush.msra.mxu1 %v2147_v44 }
  0x58   :  { %609 = vmatpush.msrb.mxu2 %v1964_v5  ;;  %629 = vmatpush.msrb.mxu3 %v1966_v6 }
  0x59   :  { %588 = vmatpush.msrb.mxu1 %v1974_v10  ;;  %419 = vmatpush.msra.mxu0 %v2153_v62 }
  0x5a   :  { %610 = vmatpush.msrb.mxu2 %v1970_v8  ;;  %630 = vmatpush.msrb.mxu3 %v1972_v9 }
  0x5b   :  { %568 = vmatpush.msrb.mxu0 %v1978_v12  ;;  %589 = vmatpush.msrb.mxu1 %v1980_v13 }
  0x5c   :  { %611 = vmatpush.msrb.mxu2 %v1983_v14  ;;  %631 = vmatpush.msrb.mxu3 %v1985_v15 }
  0x5d   :  { %569 = vmatpush.msrb.mxu0 %v1989_v16  ;;  %590 = vmatpush.msrb.mxu1 %v1991_v17 }
  0x5e   :  { %612 = vmatpush.msrb.mxu2 %v1995_v18  ;;  %632 = vmatpush.msrb.mxu3 %v1997_v19 }
  0x5f   :  { %570 = vmatpush.msrb.mxu0 %v2001_v20  ;;  %591 = vmatpush.msrb.mxu1 %v2003_v21 }
  0x60   :  { %613 = vmatpush.msrb.mxu2 %v2007_v22  ;;  %633 = vmatpush.msrb.mxu3 %v2009_v23 }
  0x61   :  { %571 = vmatpush.msrb.mxu0 %v2013_v24  ;;  %592 = vmatpush.msrb.mxu1 %v2015_v25 }
  0x62   :  { %614 = vmatpush.msrb.mxu2 %v2019_v26  ;;  %634 = vmatpush.msrb.mxu3 %v2021_v27 }
  0x63   :  { %572 = vmatpush.msrb.mxu0 %v2025_v28  ;;  %593 = vmatpush.msrb.mxu1 %v2027_v29 }
  0x64   :  { %615 = vmatpush.msrb.mxu2 %v2031_v30  ;;  %635 = vmatpush.msrb.mxu3 %v2033_v31 }
  0x65   :  { %573 = vmatpush.msrb.mxu0 %v2037_v32  ;;  %594 = vmatpush.msrb.mxu1 %v2039_v33 }
  0x66   :  { %616 = vmatpush.msrb.mxu2 %v2043_v34  ;;  %636 = vmatpush.msrb.mxu3 %v2045_v35 }
  0x67   :  { %574 = vmatpush.msrb.mxu0 %v2049_v36  ;;  %595 = vmatpush.msrb.mxu1 %v2051_v37 }
  0x68   :  { %617 = vmatpush.msrb.mxu2 %v2055_v38  ;;  %637 = vmatpush.msrb.mxu3 %v2057_v39 }
  0x69   :  { %575 = vmatpush.msrb.mxu0 %v2061_v40  ;;  %596 = vmatpush.msrb.mxu1 %v2063_v41 }
  0x6a   :  { %618 = vmatpush.msrb.mxu2 %v2067_v42  ;;  %638 = vmatpush.msrb.mxu3 %v2069_v43 }
  0x6b   :  { %576 = vmatpush.msrb.mxu0 %v2081_v47  ;;  %597 = vmatpush.msrb.mxu1 %v2083_v48 }
  0x6c   :  { %619 = vmatpush.msrb.mxu2 %v2075_v45  ;;  %639 = vmatpush.msrb.mxu3 %v2077_v46 }
  0x6d   :  { %577 = vmatpush.msrb.mxu0 %v2093_v51  ;;  %598 = vmatpush.msrb.mxu1 %v2095_v52 }
  0x6e   :  { %620 = vmatpush.msrb.mxu2 %v2087_v49  ;;  %640 = vmatpush.msrb.mxu3 %v2089_v50 }
  0x6f   :  { %578 = vmatpush.msrb.mxu0 %v2105_v55  ;;  %599 = vmatpush.msrb.mxu1 %v2107_v56 }
  0x70   :  { %621 = vmatpush.msrb.mxu2 %v2099_v53  ;;  %641 = vmatpush.msrb.mxu3 %v2101_v54 }
  0x71   :  { %579 = vmatpush.msrb.mxu0 %v2119_v59  ;;  %600 = vmatpush.msrb.mxu1 %v2121_v60 }
  0x72   :  { %622 = vmatpush.msrb.mxu2 %v2111_v57  ;;  %642 = vmatpush.msrb.mxu3 %v2113_v58  ;;  %v74_v57 = vld [vmem:[%s2797_s3] sm:$0xf] }
  0x73   :  { %580 = vmatpush.msrb.mxu0 %v2133_v63  ;;  %601 = vmatpush.msrb.mxu1 %v2135_v0  ;;  %v78_v54 = vperm.slane %v74_v57, 2  ;;  %v79_v58 = vperm.slane %v74_v57, 3  ;;  %v76_v53 = vperm.slane %v74_v57, 0  ;;  %v77_v0 = vperm.slane %v74_v57, 1 }
  0x74   :  { %623 = vmatpush.msrb.mxu2 %v2125_v61  ;;  %643 = vmatpush.msrb.mxu3 %v2934_v1 }
  0x75   :  { %581 = vmatpush.msrb.mxu0 %v2139_v2  ;;  %602 = vmatpush.msrb.mxu1 %v2141_v7 }
  0x77   :  { %582 = vmatpush.msrb.mxu0 %v2145_v11  ;;  %603 = vmatpush.msrb.mxu1 %v2147_v44 }
  0x79   :  { %583 = vmatpush.msrb.mxu0 %v2153_v62 }
  0xa9   :  { %v145_v2 = vpop.f32.mrf.mxu2  ;;  %v165_v7 = vpop.f32.mrf.mxu3 }
  0xaa   :  { %v146_v50 = vadd.f32 %v145_v2, %v78_v54  ;;  %v166_v61 = vadd.f32 %v165_v7, %v79_v58 }
  0xab   :  { %v105_v49 = vpop.f32.mrf.mxu0  ;;  %v125_v1 = vpop.f32.mrf.mxu1 }
  0xac   :  { %v106_v60 = vadd.f32 %v105_v49, %v76_v53  ;;  %v126_v11 = vadd.f32 %v125_v1, %v77_v0  ;;  %170 = vst [vmem:[#allocation2 + $0x10] sm:$0xff] %v146_v50 }
  0xad   :  { %171 = vst [vmem:[#allocation2 + $0x18] sm:$0xff] %v166_v61 }
  0xae   :  { %168 = vst [vmem:[#allocation2] sm:$0xff] %v106_v60 }
  0xaf   :  { %169 = vst [vmem:[#allocation2 + $0x8] sm:$0xff] %v126_v11 }
  0xb5   :  { %v274_v44 = vpop.f32.mrf.mxu1  ;;  %v294_v62 = vpop.f32.mrf.mxu2 }
  0xb6   :  { %v321_v63 = vrot.slane %v274_v44, 7  ;;  %v322_v46 = vrot.slane %v294_v62, 6  ;;  %v314_v45 = vpop.f32.mrf.mxu3  ;;  %v236_v49 = vld [vmem:[#allocation2] ss:$8 sm:$0xf] }
  0xb7   :  { %v323_v57 = vrot.slane %v314_v45, 5  ;;  %v254_v56 = vpop.f32.mrf.mxu0 }
  0xb8   :  { %v325_v54 = vsel %vm324_vm1, %v254_v56, %v321_v63 }
  0xb9   :  { %v327_v58 = vsel %vm326_vm2, %v322_v46, %v323_v57 }
  0xba   :  { %v329_v50 = vsel %vm328_vm3, %v325_v54, %v327_v58 }
  0xbb   :  { %v331_v53 = vadd.f32 %v329_v50, %v236_v49 }
  0xbd   :  { %v1581_v60 = vmul.f32 -1.442695, %v331_v53  ;;  %v352_v61 = vrot.slane %v331_v53, 1  ;;  %v376_v0 = vrot.slane %v331_v53, 3  ;;  %v373_v54 = vrot.slane %v331_v53, 2 }
  0xbf   :  { %1612 = vpow2.f32 %v1581_v60  ;;  %v1582_v2 = vmul.f32 -1.442695, %v352_v61  ;;  %v1583_v7 = vmul.f32 -1.442695, %v376_v0 }
  0xc1   :  { %1614 = vpow2.f32 %v1582_v2 }
  0xc2   :  { %1616 = vpow2.f32 %v1583_v7 }
  0xc5   :  { %v1613_v62 = vpop.eup %1612 }
  0xc6   :  { %v335_v45 = vadd.f32 1.0, %v1613_v62 }
  0xc7   :  { %v1615_v11 = vpop.eup %1614 }
  0xc8   :  { %v1617_v44 = vpop.eup %1616  ;;  %1618 = vrcp.f32 %v335_v45  ;;  %v357_v56 = vadd.f32 1.0, %v1615_v11  ;;  %v347_v60 = vand.u32 2147483648, %v335_v45  ;;  %v345_v7 = vand.u32 2147483647, %v335_v45 }
  0xc9   :  { %v381_v63 = vadd.f32 1.0, %v1617_v44  ;;  %vm341_vm5 = vweird.f32 %v335_v45 }
  0xca   :  { %1620 = vrcp.f32 %v357_v56  ;;  %v369_v62 = vand.u32 2147483648, %v357_v56  ;;  %v367_v59 = vand.u32 2147483647, %v357_v56  ;;  %v348_v43 = vor.u32 1.1754944e-38, %v347_v60 }
  0xcb   :  { %1622 = vrcp.f32 %v381_v63  ;;  %vm346_vm8 = vcmp.eq.f32.partialorder %v345_v7, 8.507059e+37  ;;  %vm363_vm9 = vweird.f32 %v357_v56  ;;  %v393_v60 = vand.u32 2147483648, %v381_v63  ;;  %v2954_v7 = vld [vmem:[#allocation36_spill] sm:$0xff] }
  0xcc   :  { %1624 = vtanh.f32 %v373_v54  ;;  %vm368_vm11 = vcmp.eq.f32.partialorder %v367_v59, 8.507059e+37  ;;  %vm387_vm13 = vweird.f32 %v381_v63 }
  0xce   :  { %v1619_v46 = vpop.eup %1618 }
  0xcf   :  { %v337_v1 = vmul.f32 %v1619_v46, %v335_v45  ;;  %vm342_vm4 = vweird.f32 %v1619_v46 }
  0xd0   :  { %v1621_v57 = vpop.eup %1620  ;;  %vm343_vm7 = vmor %vm341_vm5, %vm342_vm4 }
  0xd1   :  { %v1623_v58 = vpop.eup %1622  ;;  %v338_v49 = vsub.f32 1.0, %v337_v1  ;;  %v359_v50 = vmul.f32 %v1621_v57, %v357_v56  ;;  %vm364_vm6 = vweird.f32 %v1621_v57  ;;  %v394_v56 = vor.u32 1.1754944e-38, %v393_v60 }
  0xd2   :  { %v383_v61 = vmul.f32 %v1623_v58, %v381_v63  ;;  %vm365_vm10 = vmor %vm363_vm9, %vm364_vm6  ;;  %v1625_v55 = vpop.eup %1624  ;;  %vm388_vm12 = vweird.f32 %v1623_v58 }
  0xd3   :  { %v360_v0 = vsub.f32 1.0, %v359_v50  ;;  %v339_v2 = vmul.f32 %v1619_v46, %v338_v49  ;;  %v370_v50 = vor.u32 1.1754944e-38, %v369_v62  ;;  %vm389_vm14 = vmor %vm387_vm13, %vm388_vm12  ;;  %v2955_v62 = vld [vmem:[#allocation27_spill] sm:$0xff] }
  0xd4   :  { %v384_v42 = vsub.f32 1.0, %v383_v61 }
  0xd5   :  { %v340_v11 = vadd.f32 %v1619_v46, %v339_v2  ;;  %v361_v44 = vmul.f32 %v1621_v57, %v360_v0 }
  0xd6   :  { %v385_v45 = vmul.f32 %v1623_v58, %v384_v42  ;;  %v2949_v42 = vld [vmem:[#allocation35_spill] sm:$0xff] }
  0xd7   :  { %v344_v53 = vsel %vm343_vm7, %v1619_v46, %v340_v11  ;;  %v362_v1 = vadd.f32 %v1621_v57, %v361_v44  ;;  %v391_v46 = vand.u32 2147483647, %v381_v63  ;;  %v2952_v63 = vld [vmem:[#allocation24_spill] sm:$0xff]  ;;  %v2957_v44 = vld [vmem:[#allocation39_spill] sm:$0xff] }
  0xd8   :  { %v349_v52 = vsel %vm346_vm8, %v348_v43, %v344_v53  ;;  %v386_v38 = vadd.f32 %v1623_v58, %v385_v45  ;;  %v2956_v11 = vld [vmem:[#allocation28_spill] sm:$0xff]  ;;  %v2958_v53 = vld [vmem:[#allocation38_spill] sm:$0xff] }
  0xd9   :  { %v366_v49 = vsel %vm365_vm10, %v1621_v57, %v362_v1  ;;  %v398_v2 = vmul.f32 %v1625_v55, %v349_v52  ;;  %vm392_vm15 = vcmp.eq.f32.partialorder %v391_v46, 8.507059e+37  ;;  %v2950_v52 = vld [vmem:[#allocation34_spill] sm:$0xff]  ;;  %v2951_v55 = vld [vmem:[#allocation23_spill] sm:$0xff] }
  0xda   :  { %v371_v54 = vsel %vm368_vm11, %v370_v50, %v366_v49  ;;  %v390_v43 = vsel %vm389_vm14, %v1623_v58, %v386_v38  ;;  %v2947_v38 = vld [vmem:[#allocation20_spill] sm:$0xff]  ;;  %v2953_v58 = vld [vmem:[#allocation37_spill] sm:$0xff]  ;;  %v2959_v1 = vld [vmem:[#allocation31_spill] sm:$0xff] }
  0xdb   :  { %v397_v39 = vmul.f32 0.0, %v371_v54  ;;  %v395_v59 = vsel %vm392_vm15, %v394_v56, %v390_v43  ;;  %v2960_v50 = vld [vmem:[#allocation32_spill] sm:$0xff] }
  0xdd   :  { %v2290_v0 = vadd.f32 %v398_v2, %v397_v39  ;;  %v2948_v39 = vld [vmem:[#allocation21_spill] sm:$0xff] }
  0xdf   :  { %1626 = vtanh.f32 %v2290_v0 }
  0xe5   :  { %v1627_v57 = vpop.eup %1626 }
  0xe6   :  { %v401_v61 = vmul.f32 %v1627_v57, %v395_v59  ;;  %v403_v59 = vld [vmem:[#allocation2 + $0x1] ss:$8 sm:$0xf] }
  0xe8   :  { %420 = vmatmul.f32.vlgmr.msra.gmra.mxu0 %v401_v61  ;;  %440 = vmatmul.f32.vlgmr.msra.gmra.mxu1 %v401_v61 }
  0xe9   :  { %460 = vmatmul.f32.vlgmr.msra.gmra.mxu2 %v401_v61  ;;  %480 = vmatmul.f32.vlgmr.msra.gmra.mxu3 %v401_v61 }
  0xea   :  { %732 = vmatpush.msra.mxu0 %v1978_v12  ;;  %752 = vmatpush.msra.mxu1 %v1974_v10  ;;  %v2941_v10 = vld [vmem:[#allocation29_spill] sm:$0xff] }
  0xeb   :  { %772 = vmatpush.msra.mxu2 %v1960_v3  ;;  %792 = vmatpush.msra.mxu3 %v1962_v4  ;;  %v2935_v3 = vld [vmem:[#allocation14_spill] sm:$0xff]  ;;  %v2936_v4 = vld [vmem:[#allocation15_spill] sm:$0xff] }
  0xec   :  { %733 = vmatpush.msra.mxu0 %v1989_v16  ;;  %753 = vmatpush.msra.mxu1 %v1980_v13  ;;  %v2942_v13 = vld [vmem:[#allocation26_spill] sm:$0xff] }
  0xed   :  { %773 = vmatpush.msra.mxu2 %v1964_v5  ;;  %793 = vmatpush.msra.mxu3 %v1966_v6  ;;  %v2937_v5 = vld [vmem:[#allocation25_spill] sm:$0xff]  ;;  %v2938_v6 = vld [vmem:[#allocation22_spill] sm:$0xff] }
  0xee   :  { %734 = vmatpush.msra.mxu0 %v2001_v20  ;;  %754 = vmatpush.msra.mxu1 %v1991_v17 }
  0xef   :  { %774 = vmatpush.msra.mxu2 %v1970_v8  ;;  %794 = vmatpush.msra.mxu3 %v1972_v9  ;;  %v2939_v8 = vld [vmem:[#allocation16_spill] sm:$0xff]  ;;  %v2940_v9 = vld [vmem:[#allocation17_spill] sm:$0xff] }
  0xf0   :  { %735 = vmatpush.msra.mxu0 %v2013_v24  ;;  %755 = vmatpush.msra.mxu1 %v2003_v21 }
  0xf1   :  { %775 = vmatpush.msra.mxu2 %v1983_v14  ;;  %795 = vmatpush.msra.mxu3 %v1985_v15  ;;  %v2943_v14 = vld [vmem:[#allocation18_spill] sm:$0xff]  ;;  %v2944_v15 = vld [vmem:[#allocation19_spill] sm:$0xff] }
  0xf2   :  { %736 = vmatpush.msra.mxu0 %v2025_v28  ;;  %756 = vmatpush.msra.mxu1 %v2015_v25 }
  0xf3   :  { %776 = vmatpush.msra.mxu2 %v1995_v18  ;;  %796 = vmatpush.msra.mxu3 %v1997_v19  ;;  %v2945_v18 = vld [vmem:[#allocation33_spill] sm:$0xff]  ;;  %v2946_v19 = vld [vmem:[#allocation30_spill] sm:$0xff] }
  0xf4   :  { %737 = vmatpush.msra.mxu0 %v2037_v32  ;;  %757 = vmatpush.msra.mxu1 %v2027_v29 }
  0xf5   :  { %777 = vmatpush.msra.mxu2 %v2007_v22  ;;  %797 = vmatpush.msra.mxu3 %v2009_v23 }
  0xf6   :  { %738 = vmatpush.msra.mxu0 %v2049_v36  ;;  %758 = vmatpush.msra.mxu1 %v2039_v33 }
  0xf7   :  { %778 = vmatpush.msra.mxu2 %v2019_v26  ;;  %798 = vmatpush.msra.mxu3 %v2021_v27 }
  0xf8   :  { %739 = vmatpush.msra.mxu0 %v2061_v40  ;;  %759 = vmatpush.msra.mxu1 %v2051_v37 }
  0xf9   :  { %779 = vmatpush.msra.mxu2 %v2031_v30  ;;  %799 = vmatpush.msra.mxu3 %v2033_v31 }
  0xfa   :  { %740 = vmatpush.msra.mxu0 %v2081_v47  ;;  %760 = vmatpush.msra.mxu1 %v2063_v41 }
  0xfb   :  { %780 = vmatpush.msra.mxu2 %v2043_v34  ;;  %800 = vmatpush.msra.mxu3 %v2045_v35 }
  0xfc   :  { %741 = vmatpush.msra.mxu0 %v2093_v51  ;;  %761 = vmatpush.msra.mxu1 %v2083_v48 }
  0xfd   :  { %781 = vmatpush.msra.mxu2 %v2935_v3  ;;  %801 = vmatpush.msra.mxu3 %v2936_v4 }
  0xfe   :  { %742 = vmatpush.msra.mxu0 %v2937_v5  ;;  %762 = vmatpush.msra.mxu1 %v2938_v6 }
  0xff   :  { %782 = vmatpush.msra.mxu2 %v2939_v8  ;;  %802 = vmatpush.msra.mxu3 %v2940_v9 }
 0x100   :  { %743 = vmatpush.msra.mxu0 %v2941_v10  ;;  %763 = vmatpush.msra.mxu1 %v2942_v13 }
 0x101   :  { %783 = vmatpush.msra.mxu2 %v2943_v14  ;;  %803 = vmatpush.msra.mxu3 %v2944_v15 }
 0x102   :  { %744 = vmatpush.msra.mxu0 %v2945_v18  ;;  %764 = vmatpush.msra.mxu1 %v2946_v19 }
 0x103   :  { %784 = vmatpush.msra.mxu2 %v2947_v38  ;;  %804 = vmatpush.msra.mxu3 %v2948_v39 }
 0x104   :  { %745 = vmatpush.msra.mxu0 %v2949_v42  ;;  %765 = vmatpush.msra.mxu1 %v2950_v52 }
 0x105   :  { %785 = vmatpush.msra.mxu2 %v2951_v55  ;;  %805 = vmatpush.msra.mxu3 %v2952_v63 }
 0x106   :  { %746 = vmatpush.msra.mxu0 %v2953_v58  ;;  %766 = vmatpush.msra.mxu1 %v2954_v7 }
 0x107   :  { %786 = vmatpush.msra.mxu2 %v2955_v62  ;;  %806 = vmatpush.msra.mxu3 %v2956_v11 }
 0x108   :  { %747 = vmatpush.msra.mxu0 %v2957_v44  ;;  %767 = vmatpush.msra.mxu1 %v2958_v53 }
 0x109   :  { %787 = vmatpush.msra.mxu2 %v2959_v1  ;;  %807 = vmatpush.msra.mxu3 %v2960_v50 }
 0x165   :  { %v441_v49 = vpop.f32.mrf.mxu1  ;;  %v421_v43 = vpop.f32.mrf.mxu0 }
 0x166   :  { %v488_v54 = vrot.slane %v441_v49, 7 }
 0x168   :  { %v491_v56 = vsel %vm324_vm1, %v421_v43, %v488_v54 }
 0x16c   :  { %v461_v45 = vpop.f32.mrf.mxu2  ;;  %v481_v2 = vpop.f32.mrf.mxu3 }
 0x16d   :  { %v489_v60 = vrot.slane %v461_v45, 6  ;;  %v490_v46 = vrot.slane %v481_v2, 5 }
 0x16f   :  { %v492_v57 = vsel %vm326_vm2, %v489_v60, %v490_v46 }
 0x170   :  { %v493_v61 = vsel %vm328_vm3, %v491_v56, %v492_v57 }
 0x171   :  { %v495_v44 = vadd.f32 %v493_v61, %v403_v59 }
 0x173   :  { %v1584_v53 = vmul.f32 -1.442695, %v495_v44  ;;  %v516_v11 = vrot.slane %v495_v44, 1  ;;  %v540_v1 = vrot.slane %v495_v44, 3  ;;  %v537_v57 = vrot.slane %v495_v44, 2 }
 0x175   :  { %1628 = vpow2.f32 %v1584_v53  ;;  %v1585_v50 = vmul.f32 -1.442695, %v516_v11  ;;  %v1586_v62 = vmul.f32 -1.442695, %v540_v1 }
 0x177   :  { %1630 = vpow2.f32 %v1585_v50 }
 0x178   :  { %1632 = vpow2.f32 %v1586_v62 }
 0x17b   :  { %v1629_v49 = vpop.eup %1628 }
 0x17c   :  { %v499_v45 = vadd.f32 1.0, %v1629_v49 }
 0x17d   :  { %v1631_v2 = vpop.eup %1630 }
 0x17e   :  { %v1633_v7 = vpop.eup %1632  ;;  %1634 = vrcp.f32 %v499_v45  ;;  %v521_v54 = vadd.f32 1.0, %v1631_v2  ;;  %v511_v11 = vand.u32 2147483648, %v499_v45  ;;  %v509_v62 = vand.u32 2147483647, %v499_v45 }
 0x17f   :  { %v545_v43 = vadd.f32 1.0, %v1633_v7  ;;  %vm505_vm4 = vweird.f32 %v499_v45 }
 0x180   :  { %1636 = vrcp.f32 %v521_v54  ;;  %v533_v58 = vand.u32 2147483648, %v521_v54  ;;  %v531_v63 = vand.u32 2147483647, %v521_v54  ;;  %v512_v55 = vor.u32 1.1754944e-38, %v511_v11 }
 0x181   :  { %1638 = vrcp.f32 %v545_v43  ;;  %vm510_vm7 = vcmp.eq.f32.partialorder %v509_v62, 8.507059e+37  ;;  %vm527_vm8 = vweird.f32 %v521_v54  ;;  %v557_v11 = vand.u32 2147483648, %v545_v43 }
 0x182   :  { %1640 = vtanh.f32 %v537_v57  ;;  %vm532_vm10 = vcmp.eq.f32.partialorder %v531_v63, 8.507059e+37  ;;  %vm551_vm12 = vweird.f32 %v545_v43 }
 0x184   :  { %v1635_v60 = vpop.eup %1634 }
 0x185   :  { %v501_v46 = vmul.f32 %v1635_v60, %v499_v45  ;;  %vm506_vm0 = vweird.f32 %v1635_v60 }
 0x186   :  { %v1637_v56 = vpop.eup %1636  ;;  %vm507_vm6 = vmor %vm505_vm4, %vm506_vm0 }
 0x187   :  { %v1639_v59 = vpop.eup %1638  ;;  %v502_v61 = vsub.f32 1.0, %v501_v46  ;;  %v523_v53 = vmul.f32 %v1637_v56, %v521_v54  ;;  %vm528_vm5 = vweird.f32 %v1637_v56  ;;  %v555_v54 = vand.u32 2147483647, %v545_v43 }
 0x188   :  { %v547_v1 = vmul.f32 %v1639_v59, %v545_v43  ;;  %vm529_vm9 = vmor %vm527_vm8, %vm528_vm5  ;;  %vm552_vm11 = vweird.f32 %v1639_v59  ;;  %v2378_v43 = vld [vmem:[#allocation9 + $0x1d0] sm:$0xff] }
 0x189   :  { %v503_v50 = vmul.f32 %v1635_v60, %v502_v61  ;;  %v524_v49 = vsub.f32 1.0, %v523_v53  ;;  %v534_v61 = vor.u32 1.1754944e-38, %v533_v58  ;;  %v1641_v53 = vpop.eup %1640  ;;  %vm553_vm13 = vmor %vm551_vm12, %vm552_vm11  ;;  %v558_v58 = vor.u32 1.1754944e-38, %v557_v11 }
 0x18a   :  { %v548_v52 = vsub.f32 1.0, %v547_v1  ;;  %vm556_vm14 = vcmp.eq.f32.partialorder %v555_v54, 8.507059e+37  ;;  %v2397_v1 = vld [vmem:[#allocation9 + $0x198] sm:$0xff] }
 0x18b   :  { %v504_v2 = vadd.f32 %v1635_v60, %v503_v50  ;;  %v525_v7 = vmul.f32 %v1637_v56, %v524_v49 }
 0x18c   :  { %v549_v45 = vmul.f32 %v1639_v59, %v548_v52  ;;  %v2375_v52 = vld [vmem:[#allocation9 + $0x1c8] sm:$0xff] }
 0x18d   :  { %v508_v44 = vsel %vm507_vm6, %v1635_v60, %v504_v2  ;;  %v526_v46 = vadd.f32 %v1637_v56, %v525_v7 }
 0x18e   :  { %v513_v42 = vsel %vm510_vm7, %v512_v55, %v508_v44  ;;  %v550_v19 = vadd.f32 %v1639_v59, %v549_v45 }
 0x18f   :  { %v530_v39 = vsel %vm529_vm9, %v1637_v56, %v526_v46  ;;  %v562_v49 = vmul.f32 %v1641_v53, %v513_v42  ;;  %v2368_v42 = vld [vmem:[#allocation9 + $0x1f0] sm:$0xff] }
 0x190   :  { %v535_v57 = vsel %vm532_vm10, %v534_v61, %v530_v39  ;;  %v554_v55 = vsel %vm553_vm13, %v1639_v59, %v550_v19  ;;  %v2371_v19 = vld [vmem:[#allocation9 + $0x1f8] sm:$0xff]  ;;  %v2386_v56 = vld [vmem:[#allocation9 + $0x1b0] sm:$0xff] }
 0x191   :  { %v561_v50 = vmul.f32 %v535_v57, %v2290_v0  ;;  %v559_v60 = vsel %vm556_vm14, %v558_v58, %v554_v55  ;;  %v2365_v0 = vld [vmem:[#allocation9 + $0x1e8] sm:$0xff]  ;;  %v2394_v59 = vld [vmem:[#allocation9 + $0x190] sm:$0xff] }
 0x193   :  { %v2361_v38 = vadd.f32 %v562_v49, %v561_v50 }
 0x195   :  { %1642 = vtanh.f32 %v2361_v38 }
 0x19b   :  { %v1643_v63 = vpop.eup %1642 }
 0x19c   :  { %v565_v39 = vmul.f32 %v1643_v63, %v559_v60 }
 0x19e   :  { %584 = vmatmul.f32.vlgmr.msrb.gmra.mxu0 %v565_v39  ;;  %604 = vmatmul.f32.vlgmr.msrb.gmra.mxu1 %v565_v39 }
 0x19f   :  { %624 = vmatmul.f32.vlgmr.msrb.gmra.mxu2 %v565_v39  ;;  %644 = vmatmul.f32.vlgmr.msrb.gmra.mxu3 %v565_v39 }
 0x1a0   :  { %896 = vmatpush.msrb.mxu0 %v1978_v12  ;;  %916 = vmatpush.msrb.mxu1 %v2365_v0  ;;  %v2381_v12 = vld [vmem:[#allocation9 + $0x1d8] sm:$0xff] }
 0x1a1   :  { %936 = vmatpush.msrb.mxu2 %v2368_v42  ;;  %956 = vmatpush.msrb.mxu3 %v2371_v19 }
 0x1a2   :  { %897 = vmatpush.msrb.mxu0 %v1989_v16  ;;  %917 = vmatpush.msrb.mxu1 %v2375_v52  ;;  %v2389_v16 = vld [vmem:[#allocation9 + $0x1b8] sm:$0xff] }
 0x1a3   :  { %937 = vmatpush.msrb.mxu2 %v2378_v43  ;;  %957 = vmatpush.msrb.mxu3 %v2381_v12 }
 0x1a4   :  { %898 = vmatpush.msrb.mxu0 %v2001_v20  ;;  %918 = vmatpush.msrb.mxu1 %v1991_v17  ;;  %v2402_v17 = vld [vmem:[#allocation9 + $0x170] sm:$0xff]  ;;  %v2405_v20 = vld [vmem:[#allocation9 + $0x178] sm:$0xff] }
 0x1a5   :  { %938 = vmatpush.msrb.mxu2 %v2386_v56  ;;  %958 = vmatpush.msrb.mxu3 %v2389_v16 }
 0x1a6   :  { %899 = vmatpush.msrb.mxu0 %v2013_v24  ;;  %919 = vmatpush.msrb.mxu1 %v2003_v21  ;;  %v2961_v21 = vld [vmem:[#allocation30_spill] sm:$0xff]  ;;  %v2964_v24 = vld [vmem:[#allocation35_spill] sm:$0xff] }
 0x1a7   :  { %939 = vmatpush.msrb.mxu2 %v2394_v59  ;;  %959 = vmatpush.msrb.mxu3 %v2397_v1 }
 0x1a8   :  { %900 = vmatpush.msrb.mxu0 %v2025_v28  ;;  %920 = vmatpush.msrb.mxu1 %v2015_v25  ;;  %v2965_v25 = vld [vmem:[#allocation34_spill] sm:$0xff]  ;;  %v2968_v28 = vld [vmem:[#allocation37_spill] sm:$0xff] }
 0x1a9   :  { %940 = vmatpush.msrb.mxu2 %v2402_v17  ;;  %960 = vmatpush.msrb.mxu3 %v2405_v20 }
 0x1aa   :  { %901 = vmatpush.msrb.mxu0 %v2037_v32  ;;  %921 = vmatpush.msrb.mxu1 %v2027_v29  ;;  %v2969_v29 = vld [vmem:[#allocation36_spill] sm:$0xff]  ;;  %v2972_v32 = vld [vmem:[#allocation39_spill] sm:$0xff] }
 0x1ab   :  { %941 = vmatpush.msrb.mxu2 %v2007_v22  ;;  %961 = vmatpush.msrb.mxu3 %v2009_v23  ;;  %v2962_v22 = vld [vmem:[#allocation20_spill] sm:$0xff]  ;;  %v2963_v23 = vld [vmem:[#allocation21_spill] sm:$0xff] }
 0x1ac   :  { %902 = vmatpush.msrb.mxu0 %v2049_v36  ;;  %922 = vmatpush.msrb.mxu1 %v2039_v33  ;;  %v2973_v33 = vld [vmem:[#allocation38_spill] sm:$0xff] }
 0x1ad   :  { %942 = vmatpush.msrb.mxu2 %v2019_v26  ;;  %962 = vmatpush.msrb.mxu3 %v2021_v27  ;;  %v2966_v26 = vld [vmem:[#allocation23_spill] sm:$0xff]  ;;  %v2967_v27 = vld [vmem:[#allocation24_spill] sm:$0xff] }
 0x1ae   :  { %903 = vmatpush.msrb.mxu0 %v2061_v40  ;;  %923 = vmatpush.msrb.mxu1 %v2051_v37 }
 0x1af   :  { %943 = vmatpush.msrb.mxu2 %v2031_v30  ;;  %963 = vmatpush.msrb.mxu3 %v2033_v31  ;;  %v2970_v30 = vld [vmem:[#allocation27_spill] sm:$0xff]  ;;  %v2971_v31 = vld [vmem:[#allocation28_spill] sm:$0xff] }
 0x1b0   :  { %904 = vmatpush.msrb.mxu0 %v2081_v47  ;;  %924 = vmatpush.msrb.mxu1 %v2063_v41 }
 0x1b1   :  { %944 = vmatpush.msrb.mxu2 %v2043_v34  ;;  %964 = vmatpush.msrb.mxu3 %v2045_v35  ;;  %v2974_v34 = vld [vmem:[#allocation31_spill] sm:$0xff]  ;;  %v2975_v35 = vld [vmem:[#allocation32_spill] sm:$0xff] }
 0x1b2   :  { %905 = vmatpush.msrb.mxu0 %v2093_v51  ;;  %925 = vmatpush.msrb.mxu1 %v2083_v48 }
 0x1b3   :  { %945 = vmatpush.msrb.mxu2 %v2935_v3  ;;  %965 = vmatpush.msrb.mxu3 %v2936_v4 }
 0x1b4   :  { %906 = vmatpush.msrb.mxu0 %v2937_v5  ;;  %926 = vmatpush.msrb.mxu1 %v2938_v6  ;;  %v567_v5 = vld [vmem:[#allocation2 + $0x2] ss:$8 sm:$0xf] }
 0x1b5   :  { %946 = vmatpush.msrb.mxu2 %v2939_v8  ;;  %966 = vmatpush.msrb.mxu3 %v2940_v9 }
 0x1b6   :  { %907 = vmatpush.msrb.mxu0 %v2941_v10  ;;  %927 = vmatpush.msrb.mxu1 %v2942_v13 }
 0x1b7   :  { %947 = vmatpush.msrb.mxu2 %v2943_v14  ;;  %967 = vmatpush.msrb.mxu3 %v2944_v15 }
 0x1b8   :  { %908 = vmatpush.msrb.mxu0 %v2945_v18  ;;  %928 = vmatpush.msrb.mxu1 %v2961_v21 }
 0x1b9   :  { %948 = vmatpush.msrb.mxu2 %v2962_v22  ;;  %968 = vmatpush.msrb.mxu3 %v2963_v23 }
 0x1ba   :  { %909 = vmatpush.msrb.mxu0 %v2964_v24  ;;  %929 = vmatpush.msrb.mxu1 %v2965_v25 }
 0x1bb   :  { %949 = vmatpush.msrb.mxu2 %v2966_v26  ;;  %969 = vmatpush.msrb.mxu3 %v2967_v27 }
 0x1bc   :  { %910 = vmatpush.msrb.mxu0 %v2968_v28  ;;  %930 = vmatpush.msrb.mxu1 %v2969_v29 }
 0x1bd   :  { %950 = vmatpush.msrb.mxu2 %v2970_v30  ;;  %970 = vmatpush.msrb.mxu3 %v2971_v31 }
 0x1be   :  { %911 = vmatpush.msrb.mxu0 %v2972_v32  ;;  %931 = vmatpush.msrb.mxu1 %v2973_v33 }
 0x1bf   :  { %951 = vmatpush.msrb.mxu2 %v2974_v34  ;;  %971 = vmatpush.msrb.mxu3 %v2975_v35 }
 0x21b   :  { %v605_v36 = vpop.f32.mrf.mxu1  ;;  %v585_v51 = vpop.f32.mrf.mxu0 }
 0x21c   :  { %v652_v37 = vrot.slane %v605_v36, 7 }
 0x21e   :  { %v655_v3 = vsel %vm324_vm1, %v585_v51, %v652_v37 }
 0x222   :  { %v625_v40 = vpop.f32.mrf.mxu2  ;;  %v645_v41 = vpop.f32.mrf.mxu3 }
 0x223   :  { %v653_v47 = vrot.slane %v625_v40, 6  ;;  %v654_v48 = vrot.slane %v645_v41, 5 }
 0x225   :  { %v656_v4 = vsel %vm326_vm2, %v653_v47, %v654_v48 }
 0x226   :  { %v657_v6 = vsel %vm328_vm3, %v655_v3, %v656_v4 }
 0x227   :  { %v659_v8 = vadd.f32 %v657_v6, %v567_v5  ;;  %v2465_v5 = vld [vmem:[#allocation9 + $0x1c0] sm:$0xff] }
 0x228   :  { %v2471_v6 = vld [vmem:[#allocation9 + $0x1a0] sm:$0xff] }
 0x229   :  { %v1587_v9 = vmul.f32 -1.442695, %v659_v8  ;;  %v680_v10 = vrot.slane %v659_v8, 1  ;;  %v704_v13 = vrot.slane %v659_v8, 3  ;;  %v701_v45 = vrot.slane %v659_v8, 2  ;;  %v2474_v8 = vld [vmem:[#allocation9 + $0x1a8] sm:$0xff] }
 0x22b   :  { %1644 = vpow2.f32 %v1587_v9  ;;  %v1588_v14 = vmul.f32 -1.442695, %v680_v10  ;;  %v1589_v15 = vmul.f32 -1.442695, %v704_v13  ;;  %v2479_v9 = vld [vmem:[#allocation9 + $0x180] sm:$0xff]  ;;  %v2482_v10 = vld [vmem:[#allocation9 + $0x188] sm:$0xff] }
 0x22c   :  { %v2487_v13 = vld [vmem:[#allocation9 + $0x160] sm:$0xff] }
 0x22d   :  { %1646 = vpow2.f32 %v1588_v14  ;;  %v2490_v14 = vld [vmem:[#allocation9 + $0x168] sm:$0xff] }
 0x22e   :  { %1648 = vpow2.f32 %v1589_v15  ;;  %v2495_v15 = vld [vmem:[#allocation9 + $0x140] sm:$0xff] }
 0x231   :  { %v1645_v18 = vpop.eup %1644 }
 0x232   :  { %v663_v62 = vadd.f32 1.0, %v1645_v18  ;;  %v2498_v18 = vld [vmem:[#allocation9 + $0x148] sm:$0xff] }
 0x233   :  { %v1647_v2 = vpop.eup %1646 }
 0x234   :  { %v1649_v7 = vpop.eup %1648  ;;  %1650 = vrcp.f32 %v663_v62  ;;  %v685_v44 = vadd.f32 1.0, %v1647_v2  ;;  %v675_v54 = vand.u32 2147483648, %v663_v62  ;;  %v673_v63 = vand.u32 2147483647, %v663_v62  ;;  %v2504_v2 = vld [vmem:[#allocation9 + $0x158] sm:$0xff] }
 0x235   :  { %v709_v46 = vadd.f32 1.0, %v1649_v7  ;;  %vm669_vm0 = vweird.f32 %v663_v62  ;;  %v2507_v7 = vld [vmem:[#allocation9 + $0x120] sm:$0xff] }
 0x236   :  { %1652 = vrcp.f32 %v685_v44  ;;  %v697_v39 = vand.u32 2147483648, %v685_v44  ;;  %v695_v23 = vand.u32 2147483647, %v685_v44  ;;  %v676_v24 = vor.u32 1.1754944e-38, %v675_v54  ;;  %v2537_v54 = vld [vmem:[#allocation9 + $0xf0] sm:$0xff] }
 0x237   :  { %1654 = vrcp.f32 %v709_v46  ;;  %vm674_vm6 = vcmp.eq.f32.partialorder %v673_v63, 8.507059e+37  ;;  %vm691_vm7 = vweird.f32 %v685_v44  ;;  %v721_v40 = vand.u32 2147483648, %v709_v46  ;;  %v2546_v63 = vld [vmem:[#allocation9 + $0xc8] sm:$0xff] }
 0x238   :  { %1656 = vtanh.f32 %v701_v45  ;;  %v698_v29 = vor.u32 1.1754944e-38, %v697_v39  ;;  %vm696_vm9 = vcmp.eq.f32.partialorder %v695_v23, 8.507059e+37  ;;  %vm715_vm11 = vweird.f32 %v709_v46  ;;  %v2525_v45 = vld [vmem:[#allocation9 + $0x110] sm:$0xff]  ;;  %2976 = vst [vmem:[#allocation14_spill] sm:$0xff] %v2546_v63  ;;  %v2552_v39 = vld [vmem:[#allocation9 + $0xd8] sm:$0xff] }
 0x239   :  { %v719_v41 = vand.u32 2147483647, %v709_v46  ;;  %v722_v48 = vor.u32 1.1754944e-38, %v721_v40  ;;  %2978 = vst [vmem:[#allocation25_spill] sm:$0xff] %v2552_v39  ;;  %v2561_v23 = vld [vmem:[#allocation9 + $0xb0] sm:$0xff]  ;;  %v2603_v40 = vld [vmem:[#allocation9 + $0x20] sm:$0xff] }
 0x23a   :  { %v1651_v61 = vpop.eup %1650  ;;  %2981 = vst [vmem:[#allocation17_spill] sm:$0xff] %v2561_v23 }
 0x23b   :  { %v665_v53 = vmul.f32 %v1651_v61, %v663_v62  ;;  %vm670_vm15 = vweird.f32 %v1651_v61  ;;  %vm720_vm13 = vcmp.eq.f32.partialorder %v719_v41, 8.507059e+37  ;;  %v2501_v62 = vld [vmem:[#allocation9 + $0x150] sm:$0xff]  ;;  %2995 = vst [vmem:[#allocation36_spill] sm:$0xff] %v2603_v40  ;;  %v2606_v41 = vld [vmem:[#allocation9 + $0x28] sm:$0xff] }
 0x23c   :  { %v1653_v57 = vpop.eup %1652  ;;  %vm671_vm5 = vmor %vm669_vm0, %vm670_vm15  ;;  %2996 = vst [vmem:[#allocation27_spill] sm:$0xff] %v2606_v41 }
 0x23d   :  { %v1655_v50 = vpop.eup %1654  ;;  %v666_v49 = vsub.f32 1.0, %v665_v53  ;;  %v687_v11 = vmul.f32 %v1653_v57, %v685_v44  ;;  %vm692_vm4 = vweird.f32 %v1653_v57  ;;  %v2510_v44 = vld [vmem:[#allocation9 + $0x128] sm:$0xff]  ;;  %v2519_v53 = vld [vmem:[#allocation9 + $0x100] sm:$0xff] }
 0x23e   :  { %v711_v55 = vmul.f32 %v1655_v50, %v709_v46  ;;  %vm693_vm8 = vmor %vm691_vm7, %vm692_vm4  ;;  %v1657_v31 = vpop.eup %1656  ;;  %vm716_vm10 = vweird.f32 %v1655_v50  ;;  %v2513_v46 = vld [vmem:[#allocation9 + $0x130] sm:$0xff] }
 0x23f   :  { %v667_v58 = vmul.f32 %v1651_v61, %v666_v49  ;;  %v688_v60 = vsub.f32 1.0, %v687_v11  ;;  %vm717_vm12 = vmor %vm715_vm11, %vm716_vm10  ;;  %v2531_v49 = vld [vmem:[#allocation9 + $0xe0] sm:$0xff]  ;;  %v2534_v11 = vld [vmem:[#allocation9 + $0xe8] sm:$0xff] }
 0x240   :  { %v712_v25 = vsub.f32 1.0, %v711_v55  ;;  %v2540_v55 = vld [vmem:[#allocation9 + $0xf8] sm:$0xff] }
 0x241   :  { %v668_v21 = vadd.f32 %v1651_v61, %v667_v58  ;;  %v689_v22 = vmul.f32 %v1653_v57, %v688_v60  ;;  %v2543_v58 = vld [vmem:[#allocation9 + $0xc0] sm:$0xff]  ;;  %v2549_v60 = vld [vmem:[#allocation9 + $0xd0] sm:$0xff] }
 0x242   :  { %v713_v33 = vmul.f32 %v1655_v50, %v712_v25  ;;  %2977 = vst [vmem:[#allocation15_spill] sm:$0xff] %v2549_v60  ;;  %v2567_v25 = vld [vmem:[#allocation9 + $0x80] sm:$0xff] }
 0x243   :  { %v672_v26 = vsel %vm671_vm5, %v1651_v61, %v668_v21  ;;  %v690_v27 = vadd.f32 %v1653_v57, %v689_v22  ;;  %v2516_v61 = vld [vmem:[#allocation9 + $0x138] sm:$0xff]  ;;  %v2555_v21 = vld [vmem:[#allocation9 + $0xa0] sm:$0xff]  ;;  %v2558_v22 = vld [vmem:[#allocation9 + $0xa8] sm:$0xff]  ;;  %2983 = vst [vmem:[#allocation26_spill] sm:$0xff] %v2567_v25 }
 0x244   :  { %v677_v28 = vsel %vm674_vm6, %v676_v24, %v672_v26  ;;  %v714_v37 = vadd.f32 %v1655_v50, %v713_v33  ;;  %2979 = vst [vmem:[#allocation22_spill] sm:$0xff] %v2555_v21  ;;  %v2564_v24 = vld [vmem:[#allocation9 + $0xb8] sm:$0xff]  ;;  %v2570_v26 = vld [vmem:[#allocation9 + $0x88] sm:$0xff]  ;;  %v2591_v33 = vld [vmem:[#allocation9 + $0x40] sm:$0xff] }
 0x245   :  { %v694_v30 = vsel %vm693_vm8, %v1653_v57, %v690_v27  ;;  %v726_v35 = vmul.f32 %v1657_v31, %v677_v28  ;;  %v2522_v57 = vld [vmem:[#allocation9 + $0x108] sm:$0xff]  ;;  %2980 = vst [vmem:[#allocation16_spill] sm:$0xff] %v2558_v22  ;;  %v2573_v27 = vld [vmem:[#allocation9 + $0x90] sm:$0xff]  ;;  %v2576_v28 = vld [vmem:[#allocation9 + $0x98] sm:$0xff] }
 0x246   :  { %v699_v32 = vsel %vm696_vm9, %v698_v29, %v694_v30  ;;  %v718_v47 = vsel %vm717_vm12, %v1655_v50, %v714_v37  ;;  %v2528_v50 = vld [vmem:[#allocation9 + $0x118] sm:$0xff]  ;;  %2982 = vst [vmem:[#allocation29_spill] sm:$0xff] %v2564_v24  ;;  %v2579_v29 = vld [vmem:[#allocation9 + $0x60] sm:$0xff]  ;;  %v2582_v30 = vld [vmem:[#allocation9 + $0x68] sm:$0xff] }
 0x247   :  { %v725_v34 = vmul.f32 %v699_v32, %v2361_v38  ;;  %v723_v3 = vsel %vm720_vm13, %v722_v48, %v718_v47  ;;  %v2459_v38 = vld [vmem:[#allocation9 + $0x1e0] sm:$0xff]  ;;  %2984 = vst [vmem:[#allocation18_spill] sm:$0xff] %v2570_v26  ;;  %v2585_v31 = vld [vmem:[#allocation9 + $0x70] sm:$0xff]  ;;  %v2588_v32 = vld [vmem:[#allocation9 + $0x78] sm:$0xff] }
 0x248   :  { %2985 = vst [vmem:[#allocation19_spill] sm:$0xff] %v2573_v27  ;;  %v2600_v37 = vld [vmem:[#allocation9 + $0x58] sm:$0xff]  ;;  %v2609_v47 = vld [vmem:[#allocation9 + $0x30] sm:$0xff] }
 0x249   :  { %v2456_v36 = vadd.f32 %v726_v35, %v725_v34  ;;  %2986 = vst [vmem:[#allocation33_spill] sm:$0xff] %v2576_v28  ;;  %v2594_v34 = vld [vmem:[#allocation9 + $0x48] sm:$0xff]  ;;  %v2597_v35 = vld [vmem:[#allocation9 + $0x50] sm:$0xff]  ;;  %v2612_v48 = vld [vmem:[#allocation9 + $0x38] sm:$0xff] }
 0x24a   :  { %2987 = vst [vmem:[#allocation30_spill] sm:$0xff] %v2579_v29 }
 0x24b   :  { %1658 = vtanh.f32 %v2456_v36  ;;  %2988 = vst [vmem:[#allocation20_spill] sm:$0xff] %v2582_v30 }
 0x24c   :  { %2989 = vst [vmem:[#allocation21_spill] sm:$0xff] %v2585_v31 }
 0x24d   :  { %2990 = vst [vmem:[#allocation35_spill] sm:$0xff] %v2588_v32 }
 0x24e   :  { %2991 = vst [vmem:[#allocation34_spill] sm:$0xff] %v2591_v33 }
 0x24f   :  { %2992 = vst [vmem:[#allocation23_spill] sm:$0xff] %v2594_v34 }
 0x250   :  { %2993 = vst [vmem:[#allocation24_spill] sm:$0xff] %v2597_v35 }
 0x251   :  { %v1659_v51 = vpop.eup %1658  ;;  %2994 = vst [vmem:[#allocation37_spill] sm:$0xff] %v2600_v37 }
 0x252   :  { %v729_v4 = vmul.f32 %v1659_v51, %v723_v3  ;;  %2997 = vst [vmem:[#allocation28_spill] sm:$0xff] %v2609_v47  ;;  %v2615_v51 = vld [vmem:[#allocation9] sm:$0xff]  ;;  %v2618_v3 = vld [vmem:[#allocation9 + $0x8] sm:$0xff] }
 0x253   :  { %2998 = vst [vmem:[#allocation39_spill] sm:$0xff] %v2612_v48 }
 0x254   :  { %748 = vmatmul.f32.vlgmr.msra.gmra.mxu0 %v729_v4  ;;  %768 = vmatmul.f32.vlgmr.msra.gmra.mxu1 %v729_v4  ;;  %2999 = vst [vmem:[#allocation38_spill] sm:$0xff] %v2615_v51 }
 0x255   :  { %788 = vmatmul.f32.vlgmr.msra.gmra.mxu2 %v729_v4  ;;  %808 = vmatmul.f32.vlgmr.msra.gmra.mxu3 %v729_v4  ;;  %3000 = vst [vmem:[#allocation31_spill] sm:$0xff] %v2618_v3  ;;  %v2621_v4 = vld [vmem:[#allocation9 + $0x10] sm:$0xff] }
 0x256   :  { %1060 = vmatpush.msra.mxu0 %v2459_v38  ;;  %1080 = vmatpush.msra.mxu1 %v2365_v0  ;;  %3001 = vst [vmem:[#allocation32_spill] sm:$0xff] %v2621_v4 }
 0x257   :  { %1100 = vmatpush.msra.mxu2 %v2368_v42  ;;  %1120 = vmatpush.msra.mxu3 %v2371_v19 }
 0x258   :  { %1061 = vmatpush.msra.mxu0 %v2465_v5  ;;  %1081 = vmatpush.msra.mxu1 %v2375_v52 }
 0x259   :  { %1101 = vmatpush.msra.mxu2 %v2378_v43  ;;  %1121 = vmatpush.msra.mxu3 %v2381_v12 }
 0x25a   :  { %1062 = vmatpush.msra.mxu0 %v2471_v6  ;;  %1082 = vmatpush.msra.mxu1 %v2474_v8 }
 0x25b   :  { %1102 = vmatpush.msra.mxu2 %v2386_v56  ;;  %1122 = vmatpush.msra.mxu3 %v2389_v16 }
 0x25c   :  { %1063 = vmatpush.msra.mxu0 %v2479_v9  ;;  %1083 = vmatpush.msra.mxu1 %v2482_v10 }
 0x25d   :  { %1103 = vmatpush.msra.mxu2 %v2394_v59  ;;  %1123 = vmatpush.msra.mxu3 %v2397_v1 }
 0x25e   :  { %1064 = vmatpush.msra.mxu0 %v2487_v13  ;;  %1084 = vmatpush.msra.mxu1 %v2490_v14 }
 0x25f   :  { %1104 = vmatpush.msra.mxu2 %v2402_v17  ;;  %1124 = vmatpush.msra.mxu3 %v2405_v20 }
 0x260   :  { %1065 = vmatpush.msra.mxu0 %v2495_v15  ;;  %1085 = vmatpush.msra.mxu1 %v2498_v18 }
 0x261   :  { %1105 = vmatpush.msra.mxu2 %v2501_v62  ;;  %1125 = vmatpush.msra.mxu3 %v2504_v2 }
 0x262   :  { %1066 = vmatpush.msra.mxu0 %v2507_v7  ;;  %1086 = vmatpush.msra.mxu1 %v2510_v44 }
 0x263   :  { %1106 = vmatpush.msra.mxu2 %v2513_v46  ;;  %1126 = vmatpush.msra.mxu3 %v2516_v61 }
 0x264   :  { %1067 = vmatpush.msra.mxu0 %v2519_v53  ;;  %1087 = vmatpush.msra.mxu1 %v2522_v57 }
 0x265   :  { %1107 = vmatpush.msra.mxu2 %v2525_v45  ;;  %1127 = vmatpush.msra.mxu3 %v2528_v50 }
 0x266   :  { %1068 = vmatpush.msra.mxu0 %v2531_v49  ;;  %1088 = vmatpush.msra.mxu1 %v2534_v11 }
 0x267   :  { %1108 = vmatpush.msra.mxu2 %v2537_v54  ;;  %1128 = vmatpush.msra.mxu3 %v2540_v55 }
 0x268   :  { %1069 = vmatpush.msra.mxu0 %v2543_v58  ;;  %1089 = vmatpush.msra.mxu1 %v2546_v63 }
 0x269   :  { %1109 = vmatpush.msra.mxu2 %v2549_v60  ;;  %1129 = vmatpush.msra.mxu3 %v2552_v39 }
 0x26a   :  { %1070 = vmatpush.msra.mxu0 %v2555_v21  ;;  %1090 = vmatpush.msra.mxu1 %v2558_v22 }
 0x26b   :  { %1110 = vmatpush.msra.mxu2 %v2561_v23  ;;  %1130 = vmatpush.msra.mxu3 %v2564_v24 }
 0x26c   :  { %1071 = vmatpush.msra.mxu0 %v2567_v25  ;;  %1091 = vmatpush.msra.mxu1 %v2570_v26 }
 0x26d   :  { %1111 = vmatpush.msra.mxu2 %v2573_v27  ;;  %1131 = vmatpush.msra.mxu3 %v2576_v28 }
 0x26e   :  { %1072 = vmatpush.msra.mxu0 %v2579_v29  ;;  %1092 = vmatpush.msra.mxu1 %v2582_v30 }
 0x26f   :  { %1112 = vmatpush.msra.mxu2 %v2585_v31  ;;  %1132 = vmatpush.msra.mxu3 %v2588_v32 }
 0x270   :  { %1073 = vmatpush.msra.mxu0 %v2591_v33  ;;  %1093 = vmatpush.msra.mxu1 %v2594_v34 }
 0x271   :  { %1113 = vmatpush.msra.mxu2 %v2597_v35  ;;  %1133 = vmatpush.msra.mxu3 %v2600_v37 }
 0x272   :  { %1074 = vmatpush.msra.mxu0 %v2603_v40  ;;  %1094 = vmatpush.msra.mxu1 %v2606_v41  ;;  %v2624_v41 = vld [vmem:[#allocation9 + $0x18] sm:$0xff] }
 0x273   :  { %1114 = vmatpush.msra.mxu2 %v2609_v47  ;;  %1134 = vmatpush.msra.mxu3 %v2612_v48  ;;  %3002 = vst [vmem:[#allocation40_spill] sm:$0xff] %v2624_v41 }
 0x274   :  { %1075 = vmatpush.msra.mxu0 %v2615_v51  ;;  %1095 = vmatpush.msra.mxu1 %v2618_v3  ;;  %v731_v3 = vld [vmem:[#allocation2 + $0x3] ss:$8 sm:$0xf] }
 0x275   :  { %1115 = vmatpush.msra.mxu2 %v2621_v4  ;;  %1135 = vmatpush.msra.mxu3 %v2624_v41 }
 0x2d1   :  { %v769_v47 = vpop.f32.mrf.mxu1  ;;  %v749_v33 = vpop.f32.mrf.mxu0 }
 0x2d2   :  { %v816_v40 = vrot.slane %v769_v47, 7 }
 0x2d4   :  { %v819_v51 = vsel %vm324_vm1, %v749_v33, %v816_v40 }
 0x2d8   :  { %v789_v37 = vpop.f32.mrf.mxu2  ;;  %v809_v48 = vpop.f32.mrf.mxu3 }
 0x2d9   :  { %v817_v35 = vrot.slane %v789_v37, 6  ;;  %v818_v34 = vrot.slane %v809_v48, 5 }
 0x2db   :  { %v820_v32 = vsel %vm326_vm2, %v817_v35, %v818_v34 }
 0x2dc   :  { %v821_v31 = vsel %vm328_vm3, %v819_v51, %v820_v32 }
 0x2dd   :  { %v823_v30 = vadd.f32 %v821_v31, %v731_v3 }
 0x2df   :  { %v1590_v4 = vmul.f32 -1.442695, %v823_v30  ;;  %v844_v29 = vrot.slane %v823_v30, 1  ;;  %v868_v28 = vrot.slane %v823_v30, 3  ;;  %v865_v35 = vrot.slane %v823_v30, 2 }
 0x2e1   :  { %1660 = vpow2.f32 %v1590_v4  ;;  %v1591_v41 = vmul.f32 -1.442695, %v844_v29  ;;  %v1592_v27 = vmul.f32 -1.442695, %v868_v28 }
 0x2e3   :  { %1662 = vpow2.f32 %v1591_v41 }
 0x2e4   :  { %1664 = vpow2.f32 %v1592_v27 }
 0x2e7   :  { %v1661_v47 = vpop.eup %1660 }
 0x2e8   :  { %v827_v37 = vadd.f32 1.0, %v1661_v47 }
 0x2e9   :  { %v1663_v48 = vpop.eup %1662 }
 0x2ea   :  { %v1665_v26 = vpop.eup %1664  ;;  %1666 = vrcp.f32 %v827_v37  ;;  %v849_v33 = vadd.f32 1.0, %v1663_v48  ;;  %v839_v29 = vand.u32 2147483648, %v827_v37  ;;  %v837_v27 = vand.u32 2147483647, %v827_v37 }
 0x2eb   :  { %v873_v40 = vadd.f32 1.0, %v1665_v26  ;;  %vm833_vm15 = vweird.f32 %v827_v37 }
 0x2ec   :  { %1668 = vrcp.f32 %v849_v33  ;;  %v861_v25 = vand.u32 2147483648, %v849_v33  ;;  %v859_v24 = vand.u32 2147483647, %v849_v33  ;;  %v840_v23 = vor.u32 1.1754944e-38, %v839_v29 }
 0x2ed   :  { %1670 = vrcp.f32 %v873_v40  ;;  %vm838_vm5 = vcmp.eq.f32.partialorder %v837_v27, 8.507059e+37  ;;  %vm855_vm6 = vweird.f32 %v849_v33  ;;  %v885_v29 = vand.u32 2147483648, %v873_v40  ;;  %v3011_v27 = vld [vmem:[#allocation18_spill] sm:$0xff] }
 0x2ee   :  { %1672 = vtanh.f32 %v865_v35  ;;  %vm860_vm8 = vcmp.eq.f32.partialorder %v859_v24, 8.507059e+37  ;;  %vm879_vm10 = vweird.f32 %v873_v40 }
 0x2f0   :  { %v1667_v34 = vpop.eup %1666 }
 0x2f1   :  { %v829_v32 = vmul.f32 %v1667_v34, %v827_v37  ;;  %vm834_vm14 = vweird.f32 %v1667_v34 }
 0x2f2   :  { %v1669_v31 = vpop.eup %1668  ;;  %vm835_vm4 = vmor %vm833_vm15, %vm834_vm14 }
 0x2f3   :  { %v1671_v51 = vpop.eup %1670  ;;  %v830_v3 = vsub.f32 1.0, %v829_v32  ;;  %v851_v4 = vmul.f32 %v1669_v31, %v849_v33  ;;  %vm856_vm0 = vweird.f32 %v1669_v31  ;;  %v883_v33 = vand.u32 2147483647, %v873_v40 }
 0x2f4   :  { %v875_v28 = vmul.f32 %v1671_v51, %v873_v40  ;;  %vm857_vm7 = vmor %vm855_vm6, %vm856_vm0  ;;  %vm880_vm9 = vweird.f32 %v1671_v51  ;;  %v3007_v40 = vld [vmem:[#allocation16_spill] sm:$0xff] }
 0x2f5   :  { %v831_v41 = vmul.f32 %v1667_v34, %v830_v3  ;;  %v852_v47 = vsub.f32 1.0, %v851_v4  ;;  %v862_v3 = vor.u32 1.1754944e-38, %v861_v25  ;;  %v1673_v4 = vpop.eup %1672  ;;  %vm881_vm11 = vmor %vm879_vm10, %vm880_vm9  ;;  %v886_v25 = vor.u32 1.1754944e-38, %v885_v29  ;;  %v3022_v29 = vld [vmem:[#allocation36_spill] sm:$0xff] }
 0x2f6   :  { %v876_v22 = vsub.f32 1.0, %v875_v28  ;;  %vm884_vm12 = vcmp.eq.f32.partialorder %v883_v33, 8.507059e+37  ;;  %v3010_v28 = vld [vmem:[#allocation26_spill] sm:$0xff]  ;;  %v3023_v33 = vld [vmem:[#allocation27_spill] sm:$0xff] }
 0x2f7   :  { %v832_v48 = vadd.f32 %v1667_v34, %v831_v41  ;;  %v853_v26 = vmul.f32 %v1669_v31, %v852_v47 }
 0x2f8   :  { %v877_v37 = vmul.f32 %v1671_v51, %v876_v22  ;;  %v3006_v22 = vld [vmem:[#allocation22_spill] sm:$0xff] }
 0x2f9   :  { %v836_v30 = vsel %vm835_vm4, %v1667_v34, %v832_v48  ;;  %v854_v32 = vadd.f32 %v1669_v31, %v853_v26  ;;  %v3012_v48 = vld [vmem:[#allocation19_spill] sm:$0xff]  ;;  %v3013_v26 = vld [vmem:[#allocation33_spill] sm:$0xff] }
 0x2fa   :  { %v841_v21 = vsel %vm838_vm5, %v840_v23, %v836_v30  ;;  %v878_v63 = vadd.f32 %v1671_v51, %v877_v37  ;;  %v3014_v30 = vld [vmem:[#allocation30_spill] sm:$0xff]  ;;  %v3019_v37 = vld [vmem:[#allocation23_spill] sm:$0xff] }
 0x2fb   :  { %v858_v39 = vsel %vm857_vm7, %v1669_v31, %v854_v32  ;;  %v890_v47 = vmul.f32 %v1673_v4, %v841_v21  ;;  %v3005_v21 = vld [vmem:[#allocation25_spill] sm:$0xff]  ;;  %v3015_v32 = vld [vmem:[#allocation20_spill] sm:$0xff]  ;;  %v3017_v4 = vld [vmem:[#allocation35_spill] sm:$0xff] }
 0x2fc   :  { %v863_v35 = vsel %vm860_vm8, %v862_v3, %v858_v39  ;;  %v882_v23 = vsel %vm881_vm11, %v1671_v51, %v878_v63  ;;  %v3004_v63 = vld [vmem:[#allocation15_spill] sm:$0xff]  ;;  %v3008_v31 = vld [vmem:[#allocation17_spill] sm:$0xff] }
 0x2fd   :  { %v889_v41 = vmul.f32 %v863_v35, %v2456_v36  ;;  %v887_v34 = vsel %vm884_vm12, %v886_v25, %v882_v23  ;;  %v3003_v36 = vld [vmem:[#allocation14_spill] sm:$0xff]  ;;  %v3009_v51 = vld [vmem:[#allocation29_spill] sm:$0xff]  ;;  %v3024_v23 = vld [vmem:[#allocation28_spill] sm:$0xff] }
 0x2fe   :  { %v3016_v3 = vld [vmem:[#allocation21_spill] sm:$0xff]  ;;  %v3018_v35 = vld [vmem:[#allocation34_spill] sm:$0xff]  ;;  %v3025_v25 = vld [vmem:[#allocation39_spill] sm:$0xff] }
 0x2ff   :  { %v2631_v60 = vadd.f32 %v890_v47, %v889_v41  ;;  %v3020_v41 = vld [vmem:[#allocation24_spill] sm:$0xff]  ;;  %v3021_v47 = vld [vmem:[#allocation37_spill] sm:$0xff] }
 0x301   :  { %1674 = vtanh.f32 %v2631_v60 }
 0x307   :  { %v1675_v24 = vpop.eup %1674 }
 0x308   :  { %v893_v39 = vmul.f32 %v1675_v24, %v887_v34  ;;  %v3026_v24 = vld [vmem:[#allocation38_spill] sm:$0xff]  ;;  %v3027_v34 = vld [vmem:[#allocation31_spill] sm:$0xff] }
 0x30a   :  { %912 = vmatmul.f32.vlgmr.msrb.gmra.mxu0 %v893_v39  ;;  %932 = vmatmul.f32.vlgmr.msrb.gmra.mxu1 %v893_v39 }
 0x30b   :  { %952 = vmatmul.f32.vlgmr.msrb.gmra.mxu2 %v893_v39  ;;  %972 = vmatmul.f32.vlgmr.msrb.gmra.mxu3 %v893_v39  ;;  %v3028_v39 = vld [vmem:[#allocation32_spill] sm:$0xff] }
 0x30c   :  { %1224 = vmatpush.msrb.mxu0 %v2459_v38  ;;  %1244 = vmatpush.msrb.mxu1 %v2365_v0 }
 0x30d   :  { %1264 = vmatpush.msrb.mxu2 %v2368_v42  ;;  %1284 = vmatpush.msrb.mxu3 %v2371_v19 }
 0x30e   :  { %1225 = vmatpush.msrb.mxu0 %v2465_v5  ;;  %1245 = vmatpush.msrb.mxu1 %v2375_v52 }
 0x30f   :  { %1265 = vmatpush.msrb.mxu2 %v2378_v43  ;;  %1285 = vmatpush.msrb.mxu3 %v2381_v12 }
 0x310   :  { %1226 = vmatpush.msrb.mxu0 %v2471_v6  ;;  %1246 = vmatpush.msrb.mxu1 %v2474_v8 }
 0x311   :  { %1266 = vmatpush.msrb.mxu2 %v2386_v56  ;;  %1286 = vmatpush.msrb.mxu3 %v2389_v16 }
 0x312   :  { %1227 = vmatpush.msrb.mxu0 %v2479_v9  ;;  %1247 = vmatpush.msrb.mxu1 %v2482_v10 }
 0x313   :  { %1267 = vmatpush.msrb.mxu2 %v2394_v59  ;;  %1287 = vmatpush.msrb.mxu3 %v2397_v1 }
 0x314   :  { %1228 = vmatpush.msrb.mxu0 %v2487_v13  ;;  %1248 = vmatpush.msrb.mxu1 %v2490_v14 }
 0x315   :  { %1268 = vmatpush.msrb.mxu2 %v2402_v17  ;;  %1288 = vmatpush.msrb.mxu3 %v2405_v20 }
 0x316   :  { %1229 = vmatpush.msrb.mxu0 %v2495_v15  ;;  %1249 = vmatpush.msrb.mxu1 %v2498_v18 }
 0x317   :  { %1269 = vmatpush.msrb.mxu2 %v2501_v62  ;;  %1289 = vmatpush.msrb.mxu3 %v2504_v2 }
 0x318   :  { %1230 = vmatpush.msrb.mxu0 %v2507_v7  ;;  %1250 = vmatpush.msrb.mxu1 %v2510_v44 }
 0x319   :  { %1270 = vmatpush.msrb.mxu2 %v2513_v46  ;;  %1290 = vmatpush.msrb.mxu3 %v2516_v61 }
 0x31a   :  { %1231 = vmatpush.msrb.mxu0 %v2519_v53  ;;  %1251 = vmatpush.msrb.mxu1 %v2522_v57 }
 0x31b   :  { %1271 = vmatpush.msrb.mxu2 %v2525_v45  ;;  %1291 = vmatpush.msrb.mxu3 %v2528_v50 }
 0x31c   :  { %1232 = vmatpush.msrb.mxu0 %v2531_v49  ;;  %1252 = vmatpush.msrb.mxu1 %v2534_v11 }
 0x31d   :  { %1272 = vmatpush.msrb.mxu2 %v2537_v54  ;;  %1292 = vmatpush.msrb.mxu3 %v2540_v55 }
 0x31e   :  { %1233 = vmatpush.msrb.mxu0 %v2543_v58  ;;  %1253 = vmatpush.msrb.mxu1 %v3003_v36 }
 0x31f   :  { %1273 = vmatpush.msrb.mxu2 %v3004_v63  ;;  %1293 = vmatpush.msrb.mxu3 %v3005_v21 }
 0x320   :  { %1234 = vmatpush.msrb.mxu0 %v3006_v22  ;;  %1254 = vmatpush.msrb.mxu1 %v3007_v40 }
 0x321   :  { %1274 = vmatpush.msrb.mxu2 %v3008_v31  ;;  %1294 = vmatpush.msrb.mxu3 %v3009_v51 }
 0x322   :  { %1235 = vmatpush.msrb.mxu0 %v3010_v28  ;;  %1255 = vmatpush.msrb.mxu1 %v3011_v27 }
 0x323   :  { %1275 = vmatpush.msrb.mxu2 %v3012_v48  ;;  %1295 = vmatpush.msrb.mxu3 %v3013_v26 }
 0x324   :  { %1236 = vmatpush.msrb.mxu0 %v3014_v30  ;;  %1256 = vmatpush.msrb.mxu1 %v3015_v32 }
 0x325   :  { %1276 = vmatpush.msrb.mxu2 %v3016_v3  ;;  %1296 = vmatpush.msrb.mxu3 %v3017_v4 }
 0x326   :  { %1237 = vmatpush.msrb.mxu0 %v3018_v35  ;;  %1257 = vmatpush.msrb.mxu1 %v3019_v37  ;;  %v3029_v35 = vld [vmem:[#allocation40_spill] sm:$0xff] }
 0x327   :  { %1277 = vmatpush.msrb.mxu2 %v3020_v41  ;;  %1297 = vmatpush.msrb.mxu3 %v3021_v47 }
 0x328   :  { %1238 = vmatpush.msrb.mxu0 %v3022_v29  ;;  %1258 = vmatpush.msrb.mxu1 %v3023_v33 }
 0x329   :  { %1278 = vmatpush.msrb.mxu2 %v3024_v23  ;;  %1298 = vmatpush.msrb.mxu3 %v3025_v25  ;;  %v895_v25 = vld [vmem:[#allocation2 + $0x4] ss:$8 sm:$0xf] }
 0x32a   :  { %1239 = vmatpush.msrb.mxu0 %v3026_v24  ;;  %1259 = vmatpush.msrb.mxu1 %v3027_v34 }
 0x32b   :  { %1279 = vmatpush.msrb.mxu2 %v3028_v39  ;;  %1299 = vmatpush.msrb.mxu3 %v3029_v35 }
 0x387   :  { %v933_v37 = vpop.f32.mrf.mxu1  ;;  %v913_v32 = vpop.f32.mrf.mxu0 }
 0x388   :  { %v980_v41 = vrot.slane %v933_v37, 7 }
 0x38a   :  { %v983_v33 = vsel %vm324_vm1, %v913_v32, %v980_v41 }
 0x38e   :  { %v953_v4 = vpop.f32.mrf.mxu2  ;;  %v973_v47 = vpop.f32.mrf.mxu3 }
 0x38f   :  { %v981_v3 = vrot.slane %v953_v4, 6  ;;  %v982_v29 = vrot.slane %v973_v47, 5 }
 0x391   :  { %v984_v23 = vsel %vm326_vm2, %v981_v3, %v982_v29 }
 0x392   :  { %v985_v24 = vsel %vm328_vm3, %v983_v33, %v984_v23 }
 0x393   :  { %v987_v30 = vadd.f32 %v985_v24, %v895_v25 }
 0x395   :  { %v1593_v34 = vmul.f32 -1.442695, %v987_v30  ;;  %v1008_v26 = vrot.slane %v987_v30, 1  ;;  %v1032_v39 = vrot.slane %v987_v30, 3  ;;  %v1029_v23 = vrot.slane %v987_v30, 2 }
 0x397   :  { %1676 = vpow2.f32 %v1593_v34  ;;  %v1594_v35 = vmul.f32 -1.442695, %v1008_v26  ;;  %v1595_v48 = vmul.f32 -1.442695, %v1032_v39 }
 0x399   :  { %1678 = vpow2.f32 %v1594_v35 }
 0x39a   :  { %1680 = vpow2.f32 %v1595_v48 }
 0x39d   :  { %v1677_v37 = vpop.eup %1676 }
 0x39e   :  { %v991_v4 = vadd.f32 1.0, %v1677_v37 }
 0x39f   :  { %v1679_v47 = vpop.eup %1678 }
 0x3a0   :  { %v1681_v27 = vpop.eup %1680  ;;  %1682 = vrcp.f32 %v991_v4  ;;  %v1013_v32 = vadd.f32 1.0, %v1679_v47  ;;  %v1003_v26 = vand.u32 2147483648, %v991_v4  ;;  %v1001_v48 = vand.u32 2147483647, %v991_v4 }
 0x3a1   :  { %v1037_v41 = vadd.f32 1.0, %v1681_v27  ;;  %vm997_vm14 = vweird.f32 %v991_v4 }
 0x3a2   :  { %1684 = vrcp.f32 %v1013_v32  ;;  %v1025_v28 = vand.u32 2147483648, %v1013_v32  ;;  %v1023_v51 = vand.u32 2147483647, %v1013_v32  ;;  %v1004_v31 = vor.u32 1.1754944e-38, %v1003_v26 }
 0x3a3   :  { %1686 = vrcp.f32 %v1037_v41  ;;  %vm1002_vm4 = vcmp.eq.f32.partialorder %v1001_v48, 8.507059e+37  ;;  %vm1019_vm5 = vweird.f32 %v1013_v32  ;;  %v1049_v26 = vand.u32 2147483648, %v1037_v41 }
 0x3a4   :  { %1688 = vtanh.f32 %v1029_v23  ;;  %vm1024_vm7 = vcmp.eq.f32.partialorder %v1023_v51, 8.507059e+37  ;;  %vm1043_vm9 = vweird.f32 %v1037_v41 }
 0x3a6   :  { %v1683_v3 = vpop.eup %1682 }
 0x3a7   :  { %v993_v29 = vmul.f32 %v1683_v3, %v991_v4  ;;  %vm998_vm13 = vweird.f32 %v1683_v3 }
 0x3a8   :  { %v1685_v33 = vpop.eup %1684  ;;  %vm999_vm0 = vmor %vm997_vm14, %vm998_vm13 }
 0x3a9   :  { %v1687_v25 = vpop.eup %1686  ;;  %v994_v24 = vsub.f32 1.0, %v993_v29  ;;  %v1015_v34 = vmul.f32 %v1685_v33, %v1013_v32  ;;  %vm1020_vm15 = vweird.f32 %v1685_v33  ;;  %v1047_v32 = vand.u32 2147483647, %v1037_v41 }
 0x3aa   :  { %v1039_v39 = vmul.f32 %v1687_v25, %v1037_v41  ;;  %vm1021_vm6 = vmor %vm1019_vm5, %vm1020_vm15  ;;  %vm1044_vm8 = vweird.f32 %v1687_v25 }
 0x3ab   :  { %v995_v35 = vmul.f32 %v1683_v3, %v994_v24  ;;  %v1016_v37 = vsub.f32 1.0, %v1015_v34  ;;  %v1026_v24 = vor.u32 1.1754944e-38, %v1025_v28  ;;  %v1689_v34 = vpop.eup %1688  ;;  %vm1045_vm10 = vmor %vm1043_vm9, %vm1044_vm8  ;;  %v1050_v28 = vor.u32 1.1754944e-38, %v1049_v26 }
 0x3ac   :  { %v1040_v40 = vsub.f32 1.0, %v1039_v39  ;;  %vm1048_vm11 = vcmp.eq.f32.partialorder %v1047_v32, 8.507059e+37 }
 0x3ad   :  { %v996_v47 = vadd.f32 %v1683_v3, %v995_v35  ;;  %v1017_v27 = vmul.f32 %v1685_v33, %v1016_v37 }
 0x3ae   :  { %v1041_v4 = vmul.f32 %v1687_v25, %v1040_v40 }
 0x3af   :  { %v1000_v30 = vsel %vm999_vm0, %v1683_v3, %v996_v47  ;;  %v1018_v29 = vadd.f32 %v1685_v33, %v1017_v27 }
 0x3b0   :  { %v1005_v22 = vsel %vm1002_vm4, %v1004_v31, %v1000_v30  ;;  %v1042_v36 = vadd.f32 %v1687_v25, %v1041_v4 }
 0x3b1   :  { %v1022_v21 = vsel %vm1021_vm6, %v1685_v33, %v1018_v29  ;;  %v1054_v37 = vmul.f32 %v1689_v34, %v1005_v22 }
 0x3b2   :  { %v1027_v23 = vsel %vm1024_vm7, %v1026_v24, %v1022_v21  ;;  %v1046_v31 = vsel %vm1045_vm10, %v1687_v25, %v1042_v36 }
 0x3b3   :  { %v1053_v35 = vmul.f32 %v1027_v23, %v2631_v60  ;;  %v1051_v3 = vsel %vm1048_vm11, %v1050_v28, %v1046_v31 }
 0x3b5   :  { %v2702_v63 = vadd.f32 %v1054_v37, %v1053_v35 }
 0x3b7   :  { %1690 = vtanh.f32 %v2702_v63 }
 0x3bd   :  { %v1691_v51 = vpop.eup %1690 }
 0x3be   :  { %v1057_v21 = vmul.f32 %v1691_v51, %v1051_v3 }
 0x3c0   :  { %1076 = vmatmul.f32.vlgmr.msra.gmra.mxu0 %v1057_v21  ;;  %1096 = vmatmul.f32.vlgmr.msra.gmra.mxu1 %v1057_v21 }
 0x3c1   :  { %1116 = vmatmul.f32.vlgmr.msra.gmra.mxu2 %v1057_v21  ;;  %1136 = vmatmul.f32.vlgmr.msra.gmra.mxu3 %v1057_v21 }
 0x3c2   :  { %1388 = vmatpush.msra.mxu0 %v2459_v38  ;;  %1408 = vmatpush.msra.mxu1 %v2365_v0  ;;  %v3030_v0 = vld [vmem:[#allocation14_spill] sm:$0xff]  ;;  %v3042_v38 = vld [vmem:[#allocation20_spill] sm:$0xff] }
 0x3c3   :  { %1428 = vmatpush.msra.mxu2 %v2368_v42  ;;  %1448 = vmatpush.msra.mxu3 %v2371_v19  ;;  %v3031_v42 = vld [vmem:[#allocation15_spill] sm:$0xff]  ;;  %v3032_v19 = vld [vmem:[#allocation25_spill] sm:$0xff] }
 0x3c4   :  { %1389 = vmatpush.msra.mxu0 %v2465_v5  ;;  %1409 = vmatpush.msra.mxu1 %v2375_v52  ;;  %v3033_v52 = vld [vmem:[#allocation22_spill] sm:$0xff]  ;;  %v3043_v5 = vld [vmem:[#allocation21_spill] sm:$0xff] }
 0x3c5   :  { %1429 = vmatpush.msra.mxu2 %v2378_v43  ;;  %1449 = vmatpush.msra.mxu3 %v2381_v12  ;;  %v3034_v43 = vld [vmem:[#allocation16_spill] sm:$0xff]  ;;  %v3035_v12 = vld [vmem:[#allocation17_spill] sm:$0xff] }
 0x3c6   :  { %1390 = vmatpush.msra.mxu0 %v2471_v6  ;;  %1410 = vmatpush.msra.mxu1 %v2474_v8  ;;  %v3044_v6 = vld [vmem:[#allocation35_spill] sm:$0xff]  ;;  %v3045_v8 = vld [vmem:[#allocation34_spill] sm:$0xff] }
 0x3c7   :  { %1430 = vmatpush.msra.mxu2 %v2386_v56  ;;  %1450 = vmatpush.msra.mxu3 %v2389_v16  ;;  %v3036_v56 = vld [vmem:[#allocation29_spill] sm:$0xff]  ;;  %v3037_v16 = vld [vmem:[#allocation26_spill] sm:$0xff] }
 0x3c8   :  { %1391 = vmatpush.msra.mxu0 %v2479_v9  ;;  %1411 = vmatpush.msra.mxu1 %v2482_v10  ;;  %v3046_v9 = vld [vmem:[#allocation23_spill] sm:$0xff]  ;;  %v3047_v10 = vld [vmem:[#allocation24_spill] sm:$0xff] }
 0x3c9   :  { %1431 = vmatpush.msra.mxu2 %v2394_v59  ;;  %1451 = vmatpush.msra.mxu3 %v2397_v1  ;;  %v3038_v59 = vld [vmem:[#allocation18_spill] sm:$0xff]  ;;  %v3039_v1 = vld [vmem:[#allocation19_spill] sm:$0xff] }
 0x3ca   :  { %1392 = vmatpush.msra.mxu0 %v2487_v13  ;;  %1412 = vmatpush.msra.mxu1 %v2490_v14  ;;  %v3048_v13 = vld [vmem:[#allocation37_spill] sm:$0xff]  ;;  %v3049_v14 = vld [vmem:[#allocation36_spill] sm:$0xff] }
 0x3cb   :  { %1432 = vmatpush.msra.mxu2 %v2402_v17  ;;  %1452 = vmatpush.msra.mxu3 %v2405_v20  ;;  %v3040_v17 = vld [vmem:[#allocation33_spill] sm:$0xff]  ;;  %v3041_v20 = vld [vmem:[#allocation30_spill] sm:$0xff] }
 0x3cc   :  { %1393 = vmatpush.msra.mxu0 %v2495_v15  ;;  %1413 = vmatpush.msra.mxu1 %v2498_v18  ;;  %v3050_v15 = vld [vmem:[#allocation27_spill] sm:$0xff]  ;;  %v3051_v18 = vld [vmem:[#allocation28_spill] sm:$0xff] }
 0x3cd   :  { %1433 = vmatpush.msra.mxu2 %v2501_v62  ;;  %1453 = vmatpush.msra.mxu3 %v2504_v2  ;;  %v3052_v62 = vld [vmem:[#allocation39_spill] sm:$0xff]  ;;  %v3053_v2 = vld [vmem:[#allocation38_spill] sm:$0xff] }
 0x3ce   :  { %1394 = vmatpush.msra.mxu0 %v2507_v7  ;;  %1414 = vmatpush.msra.mxu1 %v2510_v44  ;;  %v3054_v7 = vld [vmem:[#allocation31_spill] sm:$0xff]  ;;  %v3055_v44 = vld [vmem:[#allocation32_spill] sm:$0xff] }
 0x3cf   :  { %1434 = vmatpush.msra.mxu2 %v2513_v46  ;;  %1454 = vmatpush.msra.mxu3 %v2516_v61  ;;  %v3056_v46 = vld [vmem:[#allocation40_spill] sm:$0xff] }
 0x3d0   :  { %1395 = vmatpush.msra.mxu0 %v2519_v53  ;;  %1415 = vmatpush.msra.mxu1 %v2522_v57 }
 0x3d1   :  { %1435 = vmatpush.msra.mxu2 %v2525_v45  ;;  %1455 = vmatpush.msra.mxu3 %v2528_v50 }
 0x3d2   :  { %1396 = vmatpush.msra.mxu0 %v2531_v49  ;;  %1416 = vmatpush.msra.mxu1 %v2534_v11 }
 0x3d3   :  { %1436 = vmatpush.msra.mxu2 %v2537_v54  ;;  %1456 = vmatpush.msra.mxu3 %v2540_v55 }
 0x3d4   :  { %1397 = vmatpush.msra.mxu0 %v2543_v58  ;;  %1417 = vmatpush.msra.mxu1 %v3030_v0  ;;  %v1059_v58 = vld [vmem:[#allocation2 + $0x5] ss:$8 sm:$0xf] }
 0x3d5   :  { %1437 = vmatpush.msra.mxu2 %v3031_v42  ;;  %1457 = vmatpush.msra.mxu3 %v3032_v19 }
 0x3d6   :  { %1398 = vmatpush.msra.mxu0 %v3033_v52  ;;  %1418 = vmatpush.msra.mxu1 %v3034_v43 }
 0x3d7   :  { %1438 = vmatpush.msra.mxu2 %v3035_v12  ;;  %1458 = vmatpush.msra.mxu3 %v3036_v56 }
 0x3d8   :  { %1399 = vmatpush.msra.mxu0 %v3037_v16  ;;  %1419 = vmatpush.msra.mxu1 %v3038_v59 }
 0x3d9   :  { %1439 = vmatpush.msra.mxu2 %v3039_v1  ;;  %1459 = vmatpush.msra.mxu3 %v3040_v17 }
 0x3da   :  { %1400 = vmatpush.msra.mxu0 %v3041_v20  ;;  %1420 = vmatpush.msra.mxu1 %v3042_v38 }
 0x3db   :  { %1440 = vmatpush.msra.mxu2 %v3043_v5  ;;  %1460 = vmatpush.msra.mxu3 %v3044_v6 }
 0x3dc   :  { %1401 = vmatpush.msra.mxu0 %v3045_v8  ;;  %1421 = vmatpush.msra.mxu1 %v3046_v9 }
 0x3dd   :  { %1441 = vmatpush.msra.mxu2 %v3047_v10  ;;  %1461 = vmatpush.msra.mxu3 %v3048_v13 }
 0x3de   :  { %1402 = vmatpush.msra.mxu0 %v3049_v14  ;;  %1422 = vmatpush.msra.mxu1 %v3050_v15 }
 0x3df   :  { %1442 = vmatpush.msra.mxu2 %v3051_v18  ;;  %1462 = vmatpush.msra.mxu3 %v3052_v62 }
 0x3e0   :  { %1403 = vmatpush.msra.mxu0 %v3053_v2  ;;  %1423 = vmatpush.msra.mxu1 %v3054_v7 }
 0x3e1   :  { %1443 = vmatpush.msra.mxu2 %v3055_v44  ;;  %1463 = vmatpush.msra.mxu3 %v3056_v46 }
 0x43d   :  { %v1097_v61 = vpop.f32.mrf.mxu1  ;;  %v1077_v11 = vpop.f32.mrf.mxu0 }
 0x43e   :  { %v1144_v53 = vrot.slane %v1097_v61, 7 }
 0x440   :  { %v1147_v54 = vsel %vm324_vm1, %v1077_v11, %v1144_v53 }
 0x444   :  { %v1117_v57 = vpop.f32.mrf.mxu2  ;;  %v1137_v45 = vpop.f32.mrf.mxu3 }
 0x445   :  { %v1145_v50 = vrot.slane %v1117_v57, 6  ;;  %v1146_v49 = vrot.slane %v1137_v45, 5 }
 0x447   :  { %v1148_v55 = vsel %vm326_vm2, %v1145_v50, %v1146_v49  ;;  %v1223_v49 = vld [vmem:[#allocation2 + $0x6] ss:$8 sm:$0xf] }
 0x448   :  { %v1149_v60 = vsel %vm328_vm3, %v1147_v54, %v1148_v55 }
 0x449   :  { %v1151_v36 = vadd.f32 %v1149_v60, %v1059_v58 }
 0x44b   :  { %v1596_v22 = vmul.f32 -1.442695, %v1151_v36  ;;  %v1172_v40 = vrot.slane %v1151_v36, 1  ;;  %v1196_v41 = vrot.slane %v1151_v36, 3  ;;  %v1193_v4 = vrot.slane %v1151_v36, 2 }
 0x44d   :  { %1692 = vpow2.f32 %v1596_v22  ;;  %v1597_v33 = vmul.f32 -1.442695, %v1172_v40  ;;  %v1598_v25 = vmul.f32 -1.442695, %v1196_v41 }
 0x44f   :  { %1694 = vpow2.f32 %v1597_v33 }
 0x450   :  { %1696 = vpow2.f32 %v1598_v25 }
 0x453   :  { %v1693_v39 = vpop.eup %1692 }
 0x454   :  { %v1155_v48 = vadd.f32 1.0, %v1693_v39 }
 0x455   :  { %v1695_v47 = vpop.eup %1694 }
 0x456   :  { %v1697_v27 = vpop.eup %1696  ;;  %1698 = vrcp.f32 %v1155_v48  ;;  %v1177_v30 = vadd.f32 1.0, %v1695_v47  ;;  %v1167_v32 = vand.u32 2147483648, %v1155_v48  ;;  %v1165_v51 = vand.u32 2147483647, %v1155_v48 }
 0x457   :  { %v1201_v29 = vadd.f32 1.0, %v1697_v27  ;;  %vm1161_vm13 = vweird.f32 %v1155_v48 }
 0x458   :  { %1700 = vrcp.f32 %v1177_v30  ;;  %v1189_v21 = vand.u32 2147483648, %v1177_v30  ;;  %v1187_v19 = vand.u32 2147483647, %v1177_v30  ;;  %v1168_v52 = vor.u32 1.1754944e-38, %v1167_v32 }
 0x459   :  { %1702 = vrcp.f32 %v1201_v29  ;;  %vm1166_vm0 = vcmp.eq.f32.partialorder %v1165_v51, 8.507059e+37  ;;  %vm1183_vm4 = vweird.f32 %v1177_v30  ;;  %v1213_v10 = vand.u32 2147483648, %v1201_v29 }
 0x45a   :  { %1704 = vtanh.f32 %v1193_v4  ;;  %v1190_v59 = vor.u32 1.1754944e-38, %v1189_v21  ;;  %vm1188_vm6 = vcmp.eq.f32.partialorder %v1187_v19, 8.507059e+37  ;;  %vm1207_vm8 = vweird.f32 %v1201_v29 }
 0x45b   :  { %v1211_v13 = vand.u32 2147483647, %v1201_v29  ;;  %v1214_v15 = vor.u32 1.1754944e-38, %v1213_v10 }
 0x45c   :  { %v1699_v24 = vpop.eup %1698 }
 0x45d   :  { %v1157_v34 = vmul.f32 %v1699_v24, %v1155_v48  ;;  %vm1162_vm12 = vweird.f32 %v1699_v24  ;;  %vm1212_vm10 = vcmp.eq.f32.partialorder %v1211_v13, 8.507059e+37 }
 0x45e   :  { %v1701_v23 = vpop.eup %1700  ;;  %vm1163_vm15 = vmor %vm1161_vm13, %vm1162_vm12 }
 0x45f   :  { %v1703_v35 = vpop.eup %1702  ;;  %v1158_v37 = vsub.f32 1.0, %v1157_v34  ;;  %v1179_v26 = vmul.f32 %v1701_v23, %v1177_v30  ;;  %vm1184_vm14 = vweird.f32 %v1701_v23 }
 0x460   :  { %v1203_v31 = vmul.f32 %v1703_v35, %v1201_v29  ;;  %vm1185_vm5 = vmor %vm1183_vm4, %vm1184_vm14  ;;  %v1705_v17 = vpop.eup %1704  ;;  %vm1208_vm7 = vweird.f32 %v1703_v35 }
 0x461   :  { %v1159_v28 = vmul.f32 %v1699_v24, %v1158_v37  ;;  %v1180_v3 = vsub.f32 1.0, %v1179_v26  ;;  %vm1209_vm9 = vmor %vm1207_vm8, %vm1208_vm7 }
 0x462   :  { %v1204_v43 = vsub.f32 1.0, %v1203_v31 }
 0x463   :  { %v1160_v0 = vadd.f32 %v1699_v24, %v1159_v28  ;;  %v1181_v42 = vmul.f32 %v1701_v23, %v1180_v3 }
 0x464   :  { %v1205_v38 = vmul.f32 %v1703_v35, %v1204_v43 }
 0x465   :  { %v1164_v12 = vsel %vm1163_vm15, %v1699_v24, %v1160_v0  ;;  %v1182_v56 = vadd.f32 %v1701_v23, %v1181_v42 }
 0x466   :  { %v1169_v16 = vsel %vm1166_vm0, %v1168_v52, %v1164_v12  ;;  %v1206_v9 = vadd.f32 %v1703_v35, %v1205_v38 }
 0x467   :  { %v1186_v1 = vsel %vm1185_vm5, %v1701_v23, %v1182_v56  ;;  %v1218_v6 = vmul.f32 %v1705_v17, %v1169_v16 }
 0x468   :  { %v1191_v20 = vsel %vm1188_vm6, %v1190_v59, %v1186_v1  ;;  %v1210_v14 = vsel %vm1209_vm9, %v1703_v35, %v1206_v9 }
 0x469   :  { %v1217_v5 = vmul.f32 %v1191_v20, %v2702_v63  ;;  %v1215_v62 = vsel %vm1212_vm10, %v1214_v15, %v1210_v14 }
 0x46b   :  { %v2773_v8 = vadd.f32 %v1218_v6, %v1217_v5 }
 0x46d   :  { %1706 = vtanh.f32 %v2773_v8 }
 0x473   :  { %v1707_v18 = vpop.eup %1706 }
 0x474   :  { %v1221_v2 = vmul.f32 %v1707_v18, %v1215_v62 }
 0x476   :  { %1240 = vmatmul.f32.vlgmr.msrb.gmra.mxu0 %v1221_v2  ;;  %1260 = vmatmul.f32.vlgmr.msrb.gmra.mxu1 %v1221_v2 }
 0x477   :  { %1280 = vmatmul.f32.vlgmr.msrb.gmra.mxu2 %v1221_v2  ;;  %1300 = vmatmul.f32.vlgmr.msrb.gmra.mxu3 %v1221_v2 }
 0x4f3   :  { %v1261_v63 = vpop.f32.mrf.mxu1  ;;  %v1241_v57 = vpop.f32.mrf.mxu0 }
 0x4f4   :  { %v1308_v7 = vrot.slane %v1261_v63, 7 }
 0x4f6   :  { %v1311_v45 = vsel %vm324_vm1, %v1241_v57, %v1308_v7 }
 0x4fa   :  { %v1281_v44 = vpop.f32.mrf.mxu2  ;;  %v1301_v46 = vpop.f32.mrf.mxu3 }
 0x4fb   :  { %v1309_v61 = vrot.slane %v1281_v44, 6  ;;  %v1310_v53 = vrot.slane %v1301_v46, 5 }
 0x4fd   :  { %v1312_v50 = vsel %vm326_vm2, %v1309_v61, %v1310_v53  ;;  %v1387_v53 = vld [vmem:[#allocation2 + $0x7] ss:$8 sm:$0xf] }
 0x4fe   :  { %v1313_v11 = vsel %vm328_vm3, %v1311_v45, %v1312_v50 }
 0x4ff   :  { %v1315_v54 = vadd.f32 %v1313_v11, %v1223_v49 }
 0x501   :  { %v1599_v55 = vmul.f32 -1.442695, %v1315_v54  ;;  %v1336_v58 = vrot.slane %v1315_v54, 1  ;;  %v1360_v60 = vrot.slane %v1315_v54, 3  ;;  %v1357_v29 = vrot.slane %v1315_v54, 2 }
 0x503   :  { %1708 = vpow2.f32 %v1599_v55  ;;  %v1600_v36 = vmul.f32 -1.442695, %v1336_v58  ;;  %v1601_v22 = vmul.f32 -1.442695, %v1360_v60 }
 0x505   :  { %1710 = vpow2.f32 %v1600_v36 }
 0x506   :  { %1712 = vpow2.f32 %v1601_v22 }
 0x509   :  { %v1709_v40 = vpop.eup %1708 }
 0x50a   :  { %v1319_v41 = vadd.f32 1.0, %v1709_v40 }
 0x50b   :  { %v1711_v33 = vpop.eup %1710 }
 0x50c   :  { %v1713_v25 = vpop.eup %1712  ;;  %1714 = vrcp.f32 %v1319_v41  ;;  %v1341_v39 = vadd.f32 1.0, %v1711_v33  ;;  %v1331_v4 = vand.u32 2147483648, %v1319_v41  ;;  %v1329_v26 = vand.u32 2147483647, %v1319_v41 }
 0x50d   :  { %v1365_v48 = vadd.f32 1.0, %v1713_v25  ;;  %vm1325_vm12 = vweird.f32 %v1319_v41 }
 0x50e   :  { %1716 = vrcp.f32 %v1341_v39  ;;  %v1353_v31 = vand.u32 2147483648, %v1341_v39  ;;  %v1351_v3 = vand.u32 2147483647, %v1341_v39  ;;  %v1332_v21 = vor.u32 1.1754944e-38, %v1331_v4 }
 0x50f   :  { %1718 = vrcp.f32 %v1365_v48  ;;  %vm1330_vm15 = vcmp.eq.f32.partialorder %v1329_v26, 8.507059e+37  ;;  %vm1347_vm0 = vweird.f32 %v1341_v39  ;;  %v1377_v5 = vand.u32 2147483648, %v1365_v48 }
 0x510   :  { %1720 = vtanh.f32 %v1357_v29  ;;  %v1354_v43 = vor.u32 1.1754944e-38, %v1353_v31  ;;  %vm1352_vm5 = vcmp.eq.f32.partialorder %v1351_v3, 8.507059e+37  ;;  %vm1371_vm7 = vweird.f32 %v1365_v48 }
 0x511   :  { %v1375_v6 = vand.u32 2147483647, %v1365_v48  ;;  %v1378_v10 = vor.u32 1.1754944e-38, %v1377_v5 }
 0x512   :  { %v1715_v47 = vpop.eup %1714 }
 0x513   :  { %v1321_v27 = vmul.f32 %v1715_v47, %v1319_v41  ;;  %vm1326_vm11 = vweird.f32 %v1715_v47  ;;  %vm1376_vm9 = vcmp.eq.f32.partialorder %v1375_v6, 8.507059e+37 }
 0x514   :  { %v1717_v30 = vpop.eup %1716  ;;  %vm1327_vm14 = vmor %vm1325_vm12, %vm1326_vm11 }
 0x515   :  { %v1719_v24 = vpop.eup %1718  ;;  %v1322_v34 = vsub.f32 1.0, %v1321_v27  ;;  %v1343_v23 = vmul.f32 %v1717_v30, %v1341_v39  ;;  %vm1348_vm13 = vweird.f32 %v1717_v30 }
 0x516   :  { %v1367_v35 = vmul.f32 %v1719_v24, %v1365_v48  ;;  %vm1349_vm4 = vmor %vm1347_vm0, %vm1348_vm13  ;;  %v1721_v56 = vpop.eup %1720  ;;  %vm1372_vm6 = vweird.f32 %v1719_v24 }
 0x517   :  { %v1323_v37 = vmul.f32 %v1715_v47, %v1322_v34  ;;  %v1344_v32 = vsub.f32 1.0, %v1343_v23  ;;  %vm1373_vm8 = vmor %vm1371_vm7, %vm1372_vm6  ;;  %vm1557_vm7 = vcmask 0  }
 0x518   :  { %v1368_v0 = vsub.f32 1.0, %v1367_v35 }
 0x519   :  { %v1324_v28 = vadd.f32 %v1715_v47, %v1323_v37  ;;  %v1345_v51 = vmul.f32 %v1717_v30, %v1344_v32 }
 0x51a   :  { %v1369_v59 = vmul.f32 %v1719_v24, %v1368_v0 }
 0x51b   :  { %v1328_v42 = vsel %vm1327_vm14, %v1715_v47, %v1324_v28  ;;  %v1346_v19 = vadd.f32 %v1717_v30, %v1345_v51 }
 0x51c   :  { %v1333_v52 = vsel %vm1330_vm15, %v1332_v21, %v1328_v42  ;;  %v1370_v38 = vadd.f32 %v1719_v24, %v1369_v59 }
 0x51d   :  { %v1350_v12 = vsel %vm1349_vm4, %v1717_v30, %v1346_v19  ;;  %v1382_v17 = vmul.f32 %v1721_v56, %v1333_v52 }
 0x51e   :  { %v1355_v16 = vsel %vm1352_vm5, %v1354_v43, %v1350_v12  ;;  %v1374_v9 = vsel %vm1373_vm8, %v1719_v24, %v1370_v38 }
 0x51f   :  { %v1381_v1 = vmul.f32 %v1355_v16, %v2773_v8  ;;  %v1379_v14 = vsel %vm1376_vm9, %v1378_v10, %v1374_v9  ;;  %v1550_v10 = vld [vmem:[%s2798_s4] sm:$0x1] }
 0x521   :  { %v2780_v20 = vadd.f32 %v1382_v17, %v1381_v1 }
 0x523   :  { %1722 = vtanh.f32 %v2780_v20 }
 0x529   :  { %v1723_v13 = vpop.eup %1722 }
 0x52a   :  { %v1385_v15 = vmul.f32 %v1723_v13, %v1379_v14 }
 0x52c   :  { %1404 = vmatmul.f32.vlgmr.msra.gmra.mxu0 %v1385_v15  ;;  %1424 = vmatmul.f32.vlgmr.msra.gmra.mxu1 %v1385_v15 }
 0x52d   :  { %1444 = vmatmul.f32.vlgmr.msra.gmra.mxu2 %v1385_v15  ;;  %1464 = vmatmul.f32.vlgmr.msra.gmra.mxu3 %v1385_v15  ;;  %v1555_v15 = vld [vmem:[#allocation3] sm:$0x1] }
 0x5a9   :  { %v1425_v8 = vpop.f32.mrf.mxu1  ;;  %v1405_v44 = vpop.f32.mrf.mxu0 }
 0x5aa   :  { %v1472_v18 = vrot.slane %v1425_v8, 7 }
 0x5ac   :  { %v1475_v46 = vsel %vm324_vm1, %v1405_v44, %v1472_v18 }
 0x5b0   :  { %v1445_v62 = vpop.f32.mrf.mxu2  ;;  %v1465_v2 = vpop.f32.mrf.mxu3 }
 0x5b1   :  { %v1473_v63 = vrot.slane %v1445_v62, 6  ;;  %v1474_v7 = vrot.slane %v1465_v2, 5 }
 0x5b3   :  { %v1476_v61 = vsel %vm326_vm2, %v1473_v63, %v1474_v7 }
 0x5b4   :  { %v1477_v57 = vsel %vm328_vm3, %v1475_v46, %v1476_v61 }
 0x5b5   :  { %v1479_v45 = vadd.f32 %v1477_v57, %v1387_v53 }
 0x5b7   :  { %v1602_v50 = vmul.f32 -1.442695, %v1479_v45  ;;  %v1500_v49 = vrot.slane %v1479_v45, 1  ;;  %v1524_v11 = vrot.slane %v1479_v45, 3  ;;  %v1521_v48 = vrot.slane %v1479_v45, 2 }
 0x5b9   :  { %1724 = vpow2.f32 %v1602_v50  ;;  %v1603_v54 = vmul.f32 -1.442695, %v1500_v49  ;;  %v1604_v55 = vmul.f32 -1.442695, %v1524_v11 }
 0x5bb   :  { %1726 = vpow2.f32 %v1603_v54 }
 0x5bc   :  { %1728 = vpow2.f32 %v1604_v55 }
 0x5bf   :  { %v1725_v58 = vpop.eup %1724 }
 0x5c0   :  { %v1483_v60 = vadd.f32 1.0, %v1725_v58 }
 0x5c1   :  { %v1727_v36 = vpop.eup %1726 }
 0x5c2   :  { %v1729_v22 = vpop.eup %1728  ;;  %1730 = vrcp.f32 %v1483_v60  ;;  %v1505_v40 = vadd.f32 1.0, %v1727_v36  ;;  %v1495_v29 = vand.u32 2147483648, %v1483_v60  ;;  %v1493_v23 = vand.u32 2147483647, %v1483_v60 }
 0x5c3   :  { %v1529_v41 = vadd.f32 1.0, %v1729_v22  ;;  %vm1489_vm3 = vweird.f32 %v1483_v60 }
 0x5c4   :  { %1732 = vrcp.f32 %v1505_v40  ;;  %v1517_v35 = vand.u32 2147483648, %v1505_v40  ;;  %v1515_v32 = vand.u32 2147483647, %v1505_v40  ;;  %v1496_v31 = vor.u32 1.1754944e-38, %v1495_v29 }
 0x5c5   :  { %1734 = vrcp.f32 %v1529_v41  ;;  %vm1494_vm12 = vcmp.eq.f32.partialorder %v1493_v23, 8.507059e+37  ;;  %vm1511_vm13 = vweird.f32 %v1505_v40  ;;  %v1541_v1 = vand.u32 2147483648, %v1529_v41 }
 0x5c6   :  { %1736 = vtanh.f32 %v1521_v48  ;;  %v1518_v0 = vor.u32 1.1754944e-38, %v1517_v35  ;;  %vm1516_vm15 = vcmp.eq.f32.partialorder %v1515_v32, 8.507059e+37  ;;  %vm1535_vm4 = vweird.f32 %v1529_v41 }
 0x5c7   :  { %v1539_v17 = vand.u32 2147483647, %v1529_v41  ;;  %v1542_v5 = vor.u32 1.1754944e-38, %v1541_v1 }
 0x5c8   :  { %v1731_v33 = vpop.eup %1730 }
 0x5c9   :  { %v1485_v25 = vmul.f32 %v1731_v33, %v1483_v60  ;;  %vm1490_vm2 = vweird.f32 %v1731_v33  ;;  %vm1540_vm6 = vcmp.eq.f32.partialorder %v1539_v17, 8.507059e+37 }
 0x5ca   :  { %v1733_v39 = vpop.eup %1732  ;;  %vm1491_vm11 = vmor %vm1489_vm3, %vm1490_vm2 }
 0x5cb   :  { %v1735_v47 = vpop.eup %1734  ;;  %v1486_v27 = vsub.f32 1.0, %v1485_v25  ;;  %v1507_v30 = vmul.f32 %v1733_v39, %v1505_v40  ;;  %vm1512_vm10 = vweird.f32 %v1733_v39 }
 0x5cc   :  { %v1531_v24 = vmul.f32 %v1735_v47, %v1529_v41  ;;  %vm1513_vm14 = vmor %vm1511_vm13, %vm1512_vm10  ;;  %v1737_v19 = vpop.eup %1736  ;;  %vm1536_vm0 = vweird.f32 %v1735_v47 }
 0x5cd   :  { %v1487_v34 = vmul.f32 %v1731_v33, %v1486_v27  ;;  %v1508_v4 = vsub.f32 1.0, %v1507_v30  ;;  %vm1537_vm5 = vmor %vm1535_vm4, %vm1536_vm0 }
 0x5ce   :  { %v1532_v28 = vsub.f32 1.0, %v1531_v24 }
 0x5cf   :  { %v1488_v37 = vadd.f32 %v1731_v33, %v1487_v34  ;;  %v1509_v26 = vmul.f32 %v1733_v39, %v1508_v4 }
 0x5d0   :  { %v1533_v43 = vmul.f32 %v1735_v47, %v1532_v28 }
 0x5d1   :  { %v1492_v51 = vsel %vm1491_vm11, %v1731_v33, %v1488_v37  ;;  %v1510_v3 = vadd.f32 %v1733_v39, %v1509_v26 }
 0x5d2   :  { %v1497_v21 = vsel %vm1494_vm12, %v1496_v31, %v1492_v51  ;;  %v1534_v59 = vadd.f32 %v1735_v47, %v1533_v43 }
 0x5d3   :  { %v1514_v42 = vsel %vm1513_vm14, %v1733_v39, %v1510_v3  ;;  %v1546_v56 = vmul.f32 %v1737_v19, %v1497_v21 }
 0x5d4   :  { %v1519_v52 = vsel %vm1516_vm15, %v1518_v0, %v1514_v42  ;;  %v1538_v38 = vsel %vm1537_vm5, %v1735_v47, %v1534_v59 }
 0x5d5   :  { %v1545_v12 = vmul.f32 %v1519_v52, %v2780_v20  ;;  %v1543_v9 = vsel %vm1540_vm6, %v1542_v5, %v1538_v38 }
 0x5d7   :  { %v1547_v16 = vadd.f32 %v1546_v56, %v1545_v12 }
 0x5d9   :  { %1738 = vtanh.f32 %v1547_v16 }
 0x5df   :  { %v1739_v6 = vpop.eup %1738 }
 0x5e0   :  { %v1549_v13 = vmul.f32 %v1739_v6, %v1543_v9 }
 0x5e2   :  { %v1551_v20 = vmul.f32 %v1550_v10, %v1549_v13 }
 0x5e4   :  { %v1552_v14 = vsel %vm324_vm1, %v1551_v20, 0.0 }
 0x5e5   :  { %1553 = vadd.xlane.f32.xlu0 %v1552_v14 }
 0x658   :  { %v1554_v8 = vpop.xlane.xlu0 %1553 }
 0x659   :  { %v1556_v18 = vadd.f32 %v1555_v15, %v1554_v8 }
 0x65b   :  { %1558 = vst.msk [vmem:[#allocation10] sm:$0x1] %vm1557_vm7, %v1556_v18 }
 0x65c   :  { %1569 = dma.vmem_to_hbm [thread:$0]  %s1565_s16, 16, %s1567_s19, [#allocation6]  }
 0x65d   :  { %1904 = dma.done.wait [#allocation6], 16  }
 0x65e   :  { %1905 = vsyncadd [#allocation6], 4294967280 }
 0x65f   :  { %1574 = vsyncpa [#allocation5], 1 }
 0x660   :  { %1575 = vsyncpa [#allocation8], 1 }
 0x661   :  { %1576 = vsyncpa [#allocation6], 1 }

</bundles_post_ra>
